<compile_context>
chip_gen: v6e
topology: v6e:2x2x1
jax: 0.10.0
libtpu: 0.0.40
codegen_flags: <defaults>
</compile_context>

<pallas_src>
import jax
import jax.numpy as jnp
from jax.experimental import pallas as pl
from jax.experimental.pallas import tpu as pltpu


def _sigmoid(x):
    # basic VPU/EUP ops only (matches torch.sigmoid to f32 rounding)
    return 1.0 / (1.0 + jnp.exp(-x))


def _make_decoder_kernel(batch, seq, num_layers, d2):
    """Fused decode-step kernel; grid axis = vocab tiles of the output projection."""

    def gru_from_gates(gi, gh, h_prev):
        # gi, gh: (B, 3*2H) with gate order (r, z, n) along lanes
        r = _sigmoid(gi[:, 0 * d2:1 * d2] + gh[:, 0 * d2:1 * d2])
        z = _sigmoid(gi[:, 1 * d2:2 * d2] + gh[:, 1 * d2:2 * d2])
        n = jnp.tanh(gi[:, 2 * d2:3 * d2] + r * gh[:, 2 * d2:3 * d2])
        return (1.0 - z) * n + z * h_prev

    def kernel(*refs):
        (tok_ref, emb_hbm_ref, enc_ref, hprojx_ref, w1x_ref, w2a_ref,
         h0_ref) = refs[:7]
        idx = 7
        wihe0_ref, wihc0_ref, whh0_ref, bih0_ref, bhh0_ref = refs[idx:idx + 5]
        idx += 5
        deep_layers = []
        for _ in range(num_layers - 1):
            deep_layers.append(tuple(refs[idx:idx + 4]))
            idx += 4
        w3_ref, b3_ref, w4_ref, b4_ref = refs[idx:idx + 4]
        idx += 4
        logits_ref, hnew_ref = refs[idx:idx + 2]
        idx += 2
        emb_buf, emb_sem, hid_scr = refs[idx:idx + 3]

        f32 = jnp.float32
        j = pl.program_id(0)

        @pl.when(j == 0)
        def _prologue():
            # ---- 1. embedding gather: DMA the B selected rows from HBM (token ids
            #         are scalars in SMEM); overlapped with the attention compute.
            copies = []
            for b in range(batch):
                cp = pltpu.make_async_copy(
                    emb_hbm_ref.at[pl.ds(tok_ref[b], 1), :],
                    emb_buf.at[pl.ds(b, 1), :],
                    emb_sem.at[b])
                cp.start()
                copies.append(cp)

            # ---- 2. attention, vectorized over the whole batch ----
            # h-projection (h[-1] @ W1h + b1) was hoisted to the wrapper and
            # pre-expanded to (B*S, H); Linear(H->1) bias dropped (softmax-invariant).
            enc_flat = enc_ref[...]                                       # (B*S, 2H)
            z = jnp.tanh(jnp.dot(enc_flat, w1x_ref[...],
                                 preferred_element_type=f32) + hprojx_ref[...])
            scores = jnp.sum(z * w2a_ref[...], axis=-1, keepdims=True)    # (B*S, 1)
            s3 = scores.reshape(batch, seq, 1)
            m = jnp.max(s3, axis=1, keepdims=True)
            p = jnp.exp(s3 - m)
            denom = jnp.sum(p, axis=1, keepdims=True)
            wts = p * pl.reciprocal(denom, approx=True)                   # (B, S, 1)
            enc3 = enc_flat.reshape(batch, seq, d2)
            ctx = jnp.sum(wts * enc3, axis=1)                             # (B, 2H)

            # ---- complete the embedding gather ----
            for cp in copies:
                cp.wait()
            emb = emb_buf[...]                                            # (B, Wd)

            # ---- 3. GRU, one timestep, fused (r|z|n) gate matmuls ----
            gi = (jnp.dot(emb, wihe0_ref[...], preferred_element_type=f32)
                  + jnp.dot(ctx, wihc0_ref[...], preferred_element_type=f32)
                  + bih0_ref[...])                                        # (B, 3*2H)
            gh = (jnp.dot(h0_ref[0], whh0_ref[...], preferred_element_type=f32)
                  + bhh0_ref[...])
            h_l = gru_from_gates(gi, gh, h0_ref[0])
            hnew_ref[0] = h_l
            for l, (wih_ref, whh_ref, bih_ref, bhh_ref) in enumerate(deep_layers, 1):
                gi = (jnp.dot(h_l, wih_ref[...], preferred_element_type=f32)
                      + bih_ref[...])
                gh = (jnp.dot(h0_ref[l], whh_ref[...], preferred_element_type=f32)
                      + bhh_ref[...])
                h_l = gru_from_gates(gi, gh, h0_ref[l])
                hnew_ref[l] = h_l

            # ---- 4a. first MLP layer + ReLU, kept in scratch for all vocab tiles
            hid_scr[...] = jnp.maximum(
                jnp.dot(h_l, w3_ref[...], preferred_element_type=f32) + b3_ref[...],
                0.0)

        # ---- 4b. vocab-tiled output projection (runs for every vocab tile) ----
        logits_ref[...] = (jnp.dot(hid_scr[...], w4_ref[...],
                                   preferred_element_type=f32) + b4_ref[...])

    return kernel


def _pack_gate_w(w):
    """(3, in, out) per-gate weights -> (in, 3*out) with gate blocks along lanes."""
    g, din, dout = w.shape
    return jnp.transpose(w, (1, 0, 2)).reshape(din, g * dout)


def _pack_gate_b(b):
    """(3, 1, out) per-gate bias -> (1, 3*out)."""
    return b.reshape(1, b.shape[0] * b.shape[2])


def decoder_pallas(tokens, h0, encoder_output, params, *, tile_v=None):
    """Fused Pallas forward of Decoder.forward (eval mode).

    tokens         : (B,)        int32  target token ids
    h0             : (L, B, 2H)  f32    incoming GRU hidden state
    encoder_output : (B, S, 2H)  f32
    returns (logits (B, vsize) f32, h_new (L, B, 2H) f32)
    """
    B, S, D2 = encoder_output.shape
    L = h0.shape[0]
    V, word_dim = params["emb"].shape
    Hh = params["attn_w1x"].shape[1]
    mlp_hidden = params["w3"].shape[1]
    hp = jax.lax.Precision.HIGHEST

    if tile_v is None:
        tile_v = V if V <= 1024 else 1024   # sweep per generation for large vocabs
    assert V % tile_v == 0 and tile_v % 128 == 0

    # Hoisted attention h-projection: one (B,2H)@(2H,H) matmul with b1 folded in,
    # pre-expanded to (B*S, H) so the kernel adds it in a single full-width pass.
    hproj = (jnp.dot(h0[-1], params["attn_w1h"], precision=hp)
             + params["attn_b1"][None, :])                                # (B, H)
    hproj_exp = jnp.repeat(hproj, S, axis=0)                              # (B*S, H)

    enc_flat = encoder_output.reshape(B * S, D2)      # batch folded into MXU M dim
    w2a = params["attn_w2"].reshape(1, Hh)
    b3 = params["b3"].reshape(1, mlp_hidden)
    b4 = params["b4"].reshape(1, V)

    g0 = params["gru"][0]
    inputs = [tokens.astype(jnp.int32), params["emb"], enc_flat, hproj_exp,
              params["attn_w1x"], w2a, h0,
              _pack_gate_w(g0["wih_emb"]), _pack_gate_w(g0["wih_ctx"]),
              _pack_gate_w(g0["whh"]), _pack_gate_b(g0["bih"]), _pack_gate_b(g0["bhh"])]
    for l in range(1, L):
        gl = params["gru"][l]
        inputs += [_pack_gate_w(gl["wih"]), _pack_gate_w(gl["whh"]),
                   _pack_gate_b(gl["bih"]), _pack_gate_b(gl["bhh"])]
    inputs += [params["w3"], b3, params["w4"], b4]

    def full_block(shape):
        nd = len(shape)
        return pl.BlockSpec(shape, lambda j, _n=nd: (0,) * _n)   # VMEM-resident, constant

    in_specs = [pl.BlockSpec(memory_space=pltpu.MemorySpace.SMEM),   # token ids (scalars)
                pl.BlockSpec(memory_space=pl.ANY)]                   # emb table stays in HBM
    in_specs += [full_block(x.shape) for x in inputs[2:-2]]
    in_specs += [pl.BlockSpec((mlp_hidden, tile_v), lambda j: (0, j)),   # w4 vocab tile
                 pl.BlockSpec((1, tile_v), lambda j: (0, j))]            # b4 vocab tile

    out_specs = (pl.BlockSpec((B, tile_v), lambda j: (0, j)),            # logits tile
                 pl.BlockSpec((L, B, D2), lambda j: (0, 0, 0)))          # h_new (resident)
    out_shape = (jax.ShapeDtypeStruct((B, V), jnp.float32),
                 jax.ShapeDtypeStruct((L, B, D2), jnp.float32))

    logits, h_new = pl.pallas_call(
        _make_decoder_kernel(B, S, L, D2),
        out_shape=out_shape,
        grid=(V // tile_v,),
        in_specs=in_specs,
        out_specs=out_specs,
        scratch_shapes=[
            pltpu.VMEM((B, word_dim), jnp.float32),    # gathered embedding rows
            pltpu.SemaphoreType.DMA((B,)),             # one sem per gather DMA
            pltpu.VMEM((B, mlp_hidden), jnp.float32),  # post-ReLU MLP activations
        ],
        compiler_params=pltpu.CompilerParams(
            # prologue is compute-once into scratch -> keep the vocab axis sequential;
            # see header comment for the megacore-sharded variant.
            dimension_semantics=("arbitrary",),
        ),
    )(*inputs)
    return logits, h_new


def decoder_reference(tokens, h0, encoder_output, params):
    """Pure-JAX mirror of the PyTorch Decoder.forward (eval mode; dropouts = identity)."""
    B, S, D2 = encoder_output.shape
    L = h0.shape[0]
    hp = jax.lax.Precision.HIGHEST

    emb = params["emb"][tokens]                                           # (B, Wd)

    # Attention (keeps b2 -> proves dropping it in the kernel is a softmax no-op)
    y_last = h0[-1]
    h_b = jnp.broadcast_to(y_last[:, None, :], (B, S, D2))
    cat = jnp.concatenate([encoder_output, h_b], axis=2)                  # (B, S, 4H)
    W1 = jnp.concatenate([params["attn_w1x"], params["attn_w1h"]], axis=0)
    z = jnp.tanh(jnp.dot(cat, W1, precision=hp) + params["attn_b1"])
    logit = jnp.dot(z, params["attn_w2"][:, None], precision=hp) + params["attn_b2"]
    wts = jax.nn.softmax(logit, axis=1)                                   # (B, S, 1)
    ctx = jnp.sum(wts * encoder_output, axis=1)                           # (B, 2H)

    # GRU, single timestep
    layer_in = jnp.concatenate([emb, ctx], axis=1)
    h_new = []
    for l in range(L):
        gl = params["gru"][l]
        wih = (jnp.concatenate([gl["wih_emb"], gl["wih_ctx"]], axis=1)
               if l == 0 else gl["wih"])
        h_prev = h0[l]
        gi = [jnp.dot(layer_in, wih[g], precision=hp) + gl["bih"][g] for g in range(3)]
        gh = [jnp.dot(h_prev, gl["whh"][g], precision=hp) + gl["bhh"][g] for g in range(3)]
        r = jax.nn.sigmoid(gi[0] + gh[0])
        zt = jax.nn.sigmoid(gi[1] + gh[1])
        n = jnp.tanh(gi[2] + r * gh[2])
        h_l = (1.0 - zt) * n + zt * h_prev
        h_new.append(h_l)
        layer_in = h_l
    h_new = jnp.stack(h_new, axis=0)

    hid = jax.nn.relu(jnp.dot(layer_in, params["w3"], precision=hp) + params["b3"])
    logits = jnp.dot(hid, params["w4"], precision=hp) + params["b4"]
    return logits, h_new


if __name__ == "__main__":
    # Small shapes consistent with the module: encoder_hidden_size = 32 (2H = 64),
    # cn_word_dim = 32, num_layers = 2, seq = 8, batch = 2, vsize = 128 (lane-dense).
    B, S, eH, L = 2, 8, 32, 2
    D2 = 2 * eH
    word_dim = 32
    vsize = 128
    mlp_hidden = 1024

    key = jax.random.PRNGKey(0)
    kit = iter(jax.random.split(key, 24))

    def nrm(shape, scale=0.05):
        return scale * jax.random.normal(next(kit), shape, dtype=jnp.float32)

    tokens = jax.random.randint(next(kit), (B,), 0, vsize, dtype=jnp.int32)
    encoder_output = jax.random.normal(next(kit), (B, S, D2), dtype=jnp.float32)
    h0 = 0.5 * jax.random.normal(next(kit), (L, B, D2), dtype=jnp.float32)

    params = {
        # nn.Embedding(vsize, cn_word_dim)
        "emb": jax.random.normal(next(kit), (vsize, word_dim), dtype=jnp.float32),
        # Attention: Linear(4H->H) split into x/h parts (stored (in, out)), Linear(H->1)
        "attn_w1x": nrm((D2, eH)),
        "attn_w1h": nrm((D2, eH)),
        "attn_b1": nrm((eH,)),
        "attn_w2": nrm((eH,)),
        "attn_b2": nrm(()),
        # GRU(cn_word_dim + 2H -> 2H, num_layers=L); gate order (r, z, n), stored (in, out)
        "gru": [
            {"wih_emb": nrm((3, word_dim, D2)),
             "wih_ctx": nrm((3, D2, D2)),
             "whh": nrm((3, D2, D2)),
             "bih": nrm((3, 1, D2)),
             "bhh": nrm((3, 1, D2))},
        ] + [
            {"wih": nrm((3, D2, D2)),
             "whh": nrm((3, D2, D2)),
             "bih": nrm((3, 1, D2)),
             "bhh": nrm((3, 1, D2))}
            for _ in range(L - 1)
        ],
        # hidden2onehot: Linear(2H, 1024) -> ReLU -> Linear(1024, vsize)
        "w3": nrm((D2, mlp_hidden)),
        "b3": nrm((mlp_hidden,)),
        "w4": nrm((mlp_hidden, vsize)),
        "b4": nrm((vsize,)),
    }

    logits, h_new = decoder_pallas(tokens, h0, encoder_output, params)
    logits, h_new = jax.block_until_ready((logits, h_new))

    ref_logits, ref_h = decoder_reference(tokens, h0, encoder_output, params)

    assert logits.shape == (B, vsize), logits.shape
    assert h_new.shape == (L, B, D2), h_new.shape
    err_l = float(jnp.max(jnp.abs(logits - ref_logits)))
    err_h = float(jnp.max(jnp.abs(h_new - ref_h)))
    assert jnp.allclose(logits, ref_logits, atol=2e-3, rtol=2e-3), err_l
    assert jnp.allclose(h_new, ref_h, atol=2e-3, rtol=2e-3), err_h

    print("KERNEL_OK")
</pallas_src>

<mosaic_0001>
module attributes {stable_mosaic.version = 11 : i64} {
  func.func @kernel(%arg0: i32, %arg1: memref<2xi32, #tpu.memory_space<smem>>, %arg2: memref<128x32xf32, #tpu.memory_space<any>>, %arg3: memref<16x64xf32, #tpu.memory_space<vmem>>, %arg4: memref<16x32xf32, #tpu.memory_space<vmem>>, %arg5: memref<64x32xf32, #tpu.memory_space<vmem>>, %arg6: memref<1x32xf32, #tpu.memory_space<vmem>>, %arg7: memref<2x2x64xf32, #tpu.memory_space<vmem>>, %arg8: memref<32x192xf32, #tpu.memory_space<vmem>>, %arg9: memref<64x192xf32, #tpu.memory_space<vmem>>, %arg10: memref<64x192xf32, #tpu.memory_space<vmem>>, %arg11: memref<1x192xf32, #tpu.memory_space<vmem>>, %arg12: memref<1x192xf32, #tpu.memory_space<vmem>>, %arg13: memref<64x192xf32, #tpu.memory_space<vmem>>, %arg14: memref<64x192xf32, #tpu.memory_space<vmem>>, %arg15: memref<1x192xf32, #tpu.memory_space<vmem>>, %arg16: memref<1x192xf32, #tpu.memory_space<vmem>>, %arg17: memref<64x1024xf32, #tpu.memory_space<vmem>>, %arg18: memref<1x1024xf32, #tpu.memory_space<vmem>>, %arg19: memref<1024x128xf32, #tpu.memory_space<vmem>>, %arg20: memref<1x128xf32, #tpu.memory_space<vmem>>, %arg21: memref<2x128xf32, #tpu.memory_space<vmem>>, %arg22: memref<2x2x64xf32, #tpu.memory_space<vmem>>, %arg23: memref<2x32xf32, #tpu.memory_space<vmem>>, %arg24: memref<2x!tpu.dma_semaphore, #tpu.memory_space<semaphore_mem>>, %arg25: memref<2x1024xf32, #tpu.memory_space<vmem>>) attributes {dimension_semantics = [#tpu.dimension_semantics<arbitrary>], iteration_bounds = array<i64: 1>, scalar_prefetch = 0 : i64, scratch_operands = 3 : i64, tpu.core_type = #tpu.core_type<tc>, window_params = [{transform_indices = @transform_0, window_bounds = array<i64: 2>}, {}, {pipeline_mode = #tpu.pipeline_mode<synchronous>, transform_indices = @transform_2, window_bounds = array<i64: 16, 64>}, {pipeline_mode = #tpu.pipeline_mode<synchronous>, transform_indices = @transform_3, window_bounds = array<i64: 16, 32>}, {pipeline_mode = #tpu.pipeline_mode<synchronous>, transform_indices = @transform_4, window_bounds = array<i64: 64, 32>}, {pipeline_mode = #tpu.pipeline_mode<synchronous>, transform_indices = @transform_5, window_bounds = array<i64: 1, 32>}, {pipeline_mode = #tpu.pipeline_mode<synchronous>, transform_indices = @transform_6, window_bounds = array<i64: 2, 2, 64>}, {pipeline_mode = #tpu.pipeline_mode<synchronous>, transform_indices = @transform_7, window_bounds = array<i64: 32, 192>}, {pipeline_mode = #tpu.pipeline_mode<synchronous>, transform_indices = @transform_8, window_bounds = array<i64: 64, 192>}, {pipeline_mode = #tpu.pipeline_mode<synchronous>, transform_indices = @transform_9, window_bounds = array<i64: 64, 192>}, {pipeline_mode = #tpu.pipeline_mode<synchronous>, transform_indices = @transform_10, window_bounds = array<i64: 1, 192>}, {pipeline_mode = #tpu.pipeline_mode<synchronous>, transform_indices = @transform_11, window_bounds = array<i64: 1, 192>}, {pipeline_mode = #tpu.pipeline_mode<synchronous>, transform_indices = @transform_12, window_bounds = array<i64: 64, 192>}, {pipeline_mode = #tpu.pipeline_mode<synchronous>, transform_indices = @transform_13, window_bounds = array<i64: 64, 192>}, {pipeline_mode = #tpu.pipeline_mode<synchronous>, transform_indices = @transform_14, window_bounds = array<i64: 1, 192>}, {pipeline_mode = #tpu.pipeline_mode<synchronous>, transform_indices = @transform_15, window_bounds = array<i64: 1, 192>}, {pipeline_mode = #tpu.pipeline_mode<synchronous>, transform_indices = @transform_16, window_bounds = array<i64: 64, 1024>}, {pipeline_mode = #tpu.pipeline_mode<synchronous>, transform_indices = @transform_17, window_bounds = array<i64: 1, 1024>}, {transform_indices = @transform_18, window_bounds = array<i64: 1024, 128>}, {transform_indices = @transform_19, window_bounds = array<i64: 1, 128>}, {transform_indices = @transform_20, window_bounds = array<i64: 2, 128>}, {pipeline_mode = #tpu.pipeline_mode<synchronous>, transform_indices = @transform_21, window_bounds = array<i64: 2, 2, 64>}]} {
    %c0_i32 = arith.constant 0 : i32
    %0 = arith.cmpi eq, %arg0, %c0_i32 : i32
    %1 = arith.extui %0 : i1 to i32
    %c0_i32_0 = arith.constant 0 : i32
    %2 = arith.cmpi ne, %1, %c0_i32_0 : i32
    scf.if %2 {
      %c0_8 = arith.constant 0 : index
      %10 = memref.load %arg1[%c0_8] : memref<2xi32, #tpu.memory_space<smem>>
      %c0_i32_9 = arith.constant 0 : i32
      %c0_i32_10 = arith.constant 0 : i32
      %11 = tpu.memref_slice %arg2[%10, %c0_i32_10] : memref<128x32xf32, #tpu.memory_space<any>> -> memref<1x32xf32, #tpu.memory_space<any>>
      %c0_i32_11 = arith.constant 0 : i32
      %c0_i32_12 = arith.constant 0 : i32
      %12 = tpu.memref_slice %arg23[%c0_i32_11, %c0_i32_12] : memref<2x32xf32, #tpu.memory_space<vmem>> -> memref<1x32xf32, #tpu.memory_space<vmem>>
      %13 = tpu.memref_slice %arg24[%c0_i32_9] : memref<2x!tpu.dma_semaphore, #tpu.memory_space<semaphore_mem>> -> memref<1x!tpu.dma_semaphore, #tpu.memory_space<semaphore_mem>>
      %14 = tpu.memref_squeeze %13 : memref<1x!tpu.dma_semaphore, #tpu.memory_space<semaphore_mem>> -> memref<!tpu.dma_semaphore, #tpu.memory_space<semaphore_mem>>
      tpu.enqueue_dma source(%11 : memref<1x32xf32, #tpu.memory_space<any>>) target(%12 : memref<1x32xf32, #tpu.memory_space<vmem>>) target_semaphore(%14 : memref<!tpu.dma_semaphore, #tpu.memory_space<semaphore_mem>>)
      %c1 = arith.constant 1 : index
      %15 = memref.load %arg1[%c1] : memref<2xi32, #tpu.memory_space<smem>>
      %c1_i32 = arith.constant 1 : i32
      %c0_i32_13 = arith.constant 0 : i32
      %16 = tpu.memref_slice %arg2[%15, %c0_i32_13] : memref<128x32xf32, #tpu.memory_space<any>> -> memref<1x32xf32, #tpu.memory_space<any>>
      %c1_i32_14 = arith.constant 1 : i32
      %c0_i32_15 = arith.constant 0 : i32
      %17 = tpu.memref_slice %arg23[%c1_i32_14, %c0_i32_15] : memref<2x32xf32, #tpu.memory_space<vmem>> -> memref<1x32xf32, #tpu.memory_space<vmem>>
      %18 = tpu.memref_slice %arg24[%c1_i32] : memref<2x!tpu.dma_semaphore, #tpu.memory_space<semaphore_mem>> -> memref<1x!tpu.dma_semaphore, #tpu.memory_space<semaphore_mem>>
      %19 = tpu.memref_squeeze %18 : memref<1x!tpu.dma_semaphore, #tpu.memory_space<semaphore_mem>> -> memref<!tpu.dma_semaphore, #tpu.memory_space<semaphore_mem>>
      tpu.enqueue_dma source(%16 : memref<1x32xf32, #tpu.memory_space<any>>) target(%17 : memref<1x32xf32, #tpu.memory_space<vmem>>) target_semaphore(%19 : memref<!tpu.dma_semaphore, #tpu.memory_space<semaphore_mem>>)
      %c0_16 = arith.constant 0 : index
      %c0_17 = arith.constant 0 : index
      %20 = vector.load %arg3[%c0_16, %c0_17] : memref<16x64xf32, #tpu.memory_space<vmem>>, vector<16x64xf32>
      %c0_18 = arith.constant 0 : index
      %c0_19 = arith.constant 0 : index
      %21 = vector.load %arg5[%c0_18, %c0_19] : memref<64x32xf32, #tpu.memory_space<vmem>>, vector<64x32xf32>
      %cst_20 = arith.constant dense<0.000000e+00> : vector<16x32xf32>
      %22 = tpu.matmul %20, %21, %cst_20 {dimension_numbers = #tpu.dot_dimension_numbers<[1], [0], [0], [1], [0, 0, 1, 1], [], []>} : vector<16x64xf32>, vector<64x32xf32>, vector<16x32xf32> -> vector<16x32xf32>
      %c0_21 = arith.constant 0 : index
      %c0_22 = arith.constant 0 : index
      %23 = vector.load %arg4[%c0_21, %c0_22] : memref<16x32xf32, #tpu.memory_space<vmem>>, vector<16x32xf32>
      %24 = arith.addf %22, %23 : vector<16x32xf32>
      %25 = math.tanh %24 : vector<16x32xf32>
      %c0_23 = arith.constant 0 : index
      %c0_24 = arith.constant 0 : index
      %26 = vector.load %arg6[%c0_23, %c0_24] : memref<1x32xf32, #tpu.memory_space<vmem>>, vector<1x32xf32>
      %27 = vector.broadcast %26 : vector<1x32xf32> to vector<16x32xf32>
      %28 = arith.mulf %25, %27 : vector<16x32xf32>
      %cst_25 = arith.constant dense<0.000000e+00> : vector<16xf32>
      %29 = vector.multi_reduction <add>, %28, %cst_25 [1] : vector<16x32xf32> to vector<16xf32>
      %30 = vector.shape_cast %29 : vector<16xf32> to vector<16x1xf32>
      %31 = vector.shape_cast %30 : vector<16x1xf32> to vector<2x8x1xf32>
      %cst_26 = arith.constant dense<0xFF800000> : vector<2x1xf32>
      %32 = vector.multi_reduction <maximumf>, %31, %cst_26 [1] : vector<2x8x1xf32> to vector<2x1xf32>
      %33 = vector.shape_cast %32 : vector<2x1xf32> to vector<2x1x1xf32>
      %34 = vector.broadcast %33 : vector<2x1x1xf32> to vector<2x8x1xf32>
      %35 = arith.subf %31, %34 : vector<2x8x1xf32>
      %36 = math.exp %35 : vector<2x8x1xf32>
      %cst_27 = arith.constant dense<0.000000e+00> : vector<2x1xf32>
      %37 = vector.multi_reduction <add>, %36, %cst_27 [1] : vector<2x8x1xf32> to vector<2x1xf32>
      %38 = vector.shape_cast %37 : vector<2x1xf32> to vector<2x1x1xf32>
      %39 = tpu.reciprocal %38 {approx = true} : vector<2x1x1xf32> -> vector<2x1x1xf32>
      %40 = vector.broadcast %39 : vector<2x1x1xf32> to vector<2x8x1xf32>
      %41 = arith.mulf %36, %40 : vector<2x8x1xf32>
      %42 = vector.shape_cast %20 : vector<16x64xf32> to vector<2x8x64xf32>
      %43 = vector.broadcast %41 : vector<2x8x1xf32> to vector<2x8x64xf32>
      %44 = arith.mulf %43, %42 : vector<2x8x64xf32>
      %cst_28 = arith.constant dense<0.000000e+00> : vector<2x64xf32>
      %45 = vector.multi_reduction <add>, %44, %cst_28 [1] : vector<2x8x64xf32> to vector<2x64xf32>
      %c0_i32_29 = arith.constant 0 : i32
      %c0_i32_30 = arith.constant 0 : i32
      %46 = tpu.memref_slice %arg2[%10, %c0_i32_30] : memref<128x32xf32, #tpu.memory_space<any>> -> memref<1x32xf32, #tpu.memory_space<any>>
      %c0_i32_31 = arith.constant 0 : i32
      %c0_i32_32 = arith.constant 0 : i32
      %47 = tpu.memref_slice %arg23[%c0_i32_31, %c0_i32_32] : memref<2x32xf32, #tpu.memory_space<vmem>> -> memref<1x32xf32, #tpu.memory_space<vmem>>
      %48 = tpu.memref_slice %arg24[%c0_i32_29] : memref<2x!tpu.dma_semaphore, #tpu.memory_space<semaphore_mem>> -> memref<1x!tpu.dma_semaphore, #tpu.memory_space<semaphore_mem>>
      %49 = tpu.memref_squeeze %48 : memref<1x!tpu.dma_semaphore, #tpu.memory_space<semaphore_mem>> -> memref<!tpu.dma_semaphore, #tpu.memory_space<semaphore_mem>>
      tpu.wait_dma2 semaphore(%49 : memref<!tpu.dma_semaphore, #tpu.memory_space<semaphore_mem>>) src(%46 : memref<1x32xf32, #tpu.memory_space<any>>) dst(%47 : memref<1x32xf32, #tpu.memory_space<vmem>>)
      %c1_i32_33 = arith.constant 1 : i32
      %c0_i32_34 = arith.constant 0 : i32
      %50 = tpu.memref_slice %arg2[%15, %c0_i32_34] : memref<128x32xf32, #tpu.memory_space<any>> -> memref<1x32xf32, #tpu.memory_space<any>>
      %c1_i32_35 = arith.constant 1 : i32
      %c0_i32_36 = arith.constant 0 : i32
      %51 = tpu.memref_slice %arg23[%c1_i32_35, %c0_i32_36] : memref<2x32xf32, #tpu.memory_space<vmem>> -> memref<1x32xf32, #tpu.memory_space<vmem>>
      %52 = tpu.memref_slice %arg24[%c1_i32_33] : memref<2x!tpu.dma_semaphore, #tpu.memory_space<semaphore_mem>> -> memref<1x!tpu.dma_semaphore, #tpu.memory_space<semaphore_mem>>
      %53 = tpu.memref_squeeze %52 : memref<1x!tpu.dma_semaphore, #tpu.memory_space<semaphore_mem>> -> memref<!tpu.dma_semaphore, #tpu.memory_space<semaphore_mem>>
      tpu.wait_dma2 semaphore(%53 : memref<!tpu.dma_semaphore, #tpu.memory_space<semaphore_mem>>) src(%50 : memref<1x32xf32, #tpu.memory_space<any>>) dst(%51 : memref<1x32xf32, #tpu.memory_space<vmem>>)
      %c0_37 = arith.constant 0 : index
      %c0_38 = arith.constant 0 : index
      %54 = vector.load %arg23[%c0_37, %c0_38] : memref<2x32xf32, #tpu.memory_space<vmem>>, vector<2x32xf32>
      %c0_39 = arith.constant 0 : index
      %c0_40 = arith.constant 0 : index
      %55 = vector.load %arg8[%c0_39, %c0_40] : memref<32x192xf32, #tpu.memory_space<vmem>>, vector<32x192xf32>
      %cst_41 = arith.constant dense<0.000000e+00> : vector<2x192xf32>
      %56 = tpu.matmul %54, %55, %cst_41 {dimension_numbers = #tpu.dot_dimension_numbers<[1], [0], [0], [1], [0, 0, 1, 1], [], []>} : vector<2x32xf32>, vector<32x192xf32>, vector<2x192xf32> -> vector<2x192xf32>
      %c0_42 = arith.constant 0 : index
      %c0_43 = arith.constant 0 : index
      %57 = vector.load %arg9[%c0_42, %c0_43] : memref<64x192xf32, #tpu.memory_space<vmem>>, vector<64x192xf32>
      %cst_44 = arith.constant dense<0.000000e+00> : vector<2x192xf32>
      %58 = tpu.matmul %45, %57, %cst_44 {dimension_numbers = #tpu.dot_dimension_numbers<[1], [0], [0], [1], [0, 0, 1, 1], [], []>} : vector<2x64xf32>, vector<64x192xf32>, vector<2x192xf32> -> vector<2x192xf32>
      %59 = arith.addf %56, %58 : vector<2x192xf32>
      %c0_45 = arith.constant 0 : index
      %c0_46 = arith.constant 0 : index
      %60 = vector.load %arg11[%c0_45, %c0_46] : memref<1x192xf32, #tpu.memory_space<vmem>>, vector<1x192xf32>
      %61 = vector.broadcast %60 : vector<1x192xf32> to vector<2x192xf32>
      %62 = arith.addf %59, %61 : vector<2x192xf32>
      %c0_47 = arith.constant 0 : index
      %c0_48 = arith.constant 0 : index
      %c0_49 = arith.constant 0 : index
      %63 = vector.load %arg7[%c0_47, %c0_48, %c0_49] : memref<2x2x64xf32, #tpu.memory_space<vmem>>, vector<1x2x64xf32>
      %64 = vector.shape_cast %63 : vector<1x2x64xf32> to vector<2x64xf32>
      %c0_50 = arith.constant 0 : index
      %c0_51 = arith.constant 0 : index
      %65 = vector.load %arg10[%c0_50, %c0_51] : memref<64x192xf32, #tpu.memory_space<vmem>>, vector<64x192xf32>
      %cst_52 = arith.constant dense<0.000000e+00> : vector<2x192xf32>
      %66 = tpu.matmul %64, %65, %cst_52 {dimension_numbers = #tpu.dot_dimension_numbers<[1], [0], [0], [1], [0, 0, 1, 1], [], []>} : vector<2x64xf32>, vector<64x192xf32>, vector<2x192xf32> -> vector<2x192xf32>
      %c0_53 = arith.constant 0 : index
      %c0_54 = arith.constant 0 : index
      %67 = vector.load %arg12[%c0_53, %c0_54] : memref<1x192xf32, #tpu.memory_space<vmem>>, vector<1x192xf32>
      %68 = vector.broadcast %67 : vector<1x192xf32> to vector<2x192xf32>
      %69 = arith.addf %66, %68 : vector<2x192xf32>
      %c0_55 = arith.constant 0 : index
      %c0_56 = arith.constant 0 : index
      %c0_57 = arith.constant 0 : index
      %70 = vector.load %arg7[%c0_55, %c0_56, %c0_57] : memref<2x2x64xf32, #tpu.memory_space<vmem>>, vector<1x2x64xf32>
      %71 = vector.shape_cast %70 : vector<1x2x64xf32> to vector<2x64xf32>
      %72 = vector.extract_strided_slice %62 {offsets = [0, 0], sizes = [2, 64], strides = [1, 1]} : vector<2x192xf32> to vector<2x64xf32>
      %73 = vector.extract_strided_slice %69 {offsets = [0, 0], sizes = [2, 64], strides = [1, 1]} : vector<2x192xf32> to vector<2x64xf32>
      %74 = arith.addf %72, %73 : vector<2x64xf32>
      %cst_58 = arith.constant 0.000000e+00 : f32
      %75 = vector.broadcast %cst_58 : f32 to vector<2x64xf32>
      %76 = arith.subf %75, %74 : vector<2x64xf32>
      %77 = math.exp %76 : vector<2x64xf32>
      %cst_59 = arith.constant 1.000000e+00 : f32
      %78 = vector.broadcast %cst_59 : f32 to vector<2x64xf32>
      %79 = arith.addf %78, %77 : vector<2x64xf32>
      %cst_60 = arith.constant 1.000000e+00 : f32
      %80 = vector.broadcast %cst_60 : f32 to vector<2x64xf32>
      %81 = arith.divf %80, %79 : vector<2x64xf32>
      %82 = vector.extract_strided_slice %62 {offsets = [0, 64], sizes = [2, 64], strides = [1, 1]} : vector<2x192xf32> to vector<2x64xf32>
      %83 = vector.extract_strided_slice %69 {offsets = [0, 64], sizes = [2, 64], strides = [1, 1]} : vector<2x192xf32> to vector<2x64xf32>
      %84 = arith.addf %82, %83 : vector<2x64xf32>
      %cst_61 = arith.constant 0.000000e+00 : f32
      %85 = vector.broadcast %cst_61 : f32 to vector<2x64xf32>
      %86 = arith.subf %85, %84 : vector<2x64xf32>
      %87 = math.exp %86 : vector<2x64xf32>
      %cst_62 = arith.constant 1.000000e+00 : f32
      %88 = vector.broadcast %cst_62 : f32 to vector<2x64xf32>
      %89 = arith.addf %88, %87 : vector<2x64xf32>
      %cst_63 = arith.constant 1.000000e+00 : f32
      %90 = vector.broadcast %cst_63 : f32 to vector<2x64xf32>
      %91 = arith.divf %90, %89 : vector<2x64xf32>
      %92 = vector.extract_strided_slice %62 {offsets = [0, 128], sizes = [2, 64], strides = [1, 1]} : vector<2x192xf32> to vector<2x64xf32>
      %93 = vector.extract_strided_slice %69 {offsets = [0, 128], sizes = [2, 64], strides = [1, 1]} : vector<2x192xf32> to vector<2x64xf32>
      %94 = arith.mulf %81, %93 : vector<2x64xf32>
      %95 = arith.addf %92, %94 : vector<2x64xf32>
      %96 = math.tanh %95 : vector<2x64xf32>
      %cst_64 = arith.constant 1.000000e+00 : f32
      %97 = vector.broadcast %cst_64 : f32 to vector<2x64xf32>
      %98 = arith.subf %97, %91 : vector<2x64xf32>
      %99 = arith.mulf %98, %96 : vector<2x64xf32>
      %100 = arith.mulf %91, %71 : vector<2x64xf32>
      %101 = arith.addf %99, %100 : vector<2x64xf32>
      %c0_65 = arith.constant 0 : index
      %c0_66 = arith.constant 0 : index
      %c0_67 = arith.constant 0 : index
      %102 = vector.load %arg22[%c0_65, %c0_66, %c0_67] : memref<2x2x64xf32, #tpu.memory_space<vmem>>, vector<1x2x64xf32>
      %103 = vector.shape_cast %102 : vector<1x2x64xf32> to vector<2x64xf32>
      %104 = vector.shape_cast %101 : vector<2x64xf32> to vector<1x2x64xf32>
      tpu.vector_store %arg22[%c0_65, %c0_66, %c0_67], %104 {strides = array<i32>} : memref<2x2x64xf32, #tpu.memory_space<vmem>>, vector<1x2x64xf32>,
      %c0_68 = arith.constant 0 : index
      %c0_69 = arith.constant 0 : index
      %105 = vector.load %arg13[%c0_68, %c0_69] : memref<64x192xf32, #tpu.memory_space<vmem>>, vector<64x192xf32>
      %cst_70 = arith.constant dense<0.000000e+00> : vector<2x192xf32>
      %106 = tpu.matmul %101, %105, %cst_70 {dimension_numbers = #tpu.dot_dimension_numbers<[1], [0], [0], [1], [0, 0, 1, 1], [], []>} : vector<2x64xf32>, vector<64x192xf32>, vector<2x192xf32> -> vector<2x192xf32>
      %c0_71 = arith.constant 0 : index
      %c0_72 = arith.constant 0 : index
      %107 = vector.load %arg15[%c0_71, %c0_72] : memref<1x192xf32, #tpu.memory_space<vmem>>, vector<1x192xf32>
      %108 = vector.broadcast %107 : vector<1x192xf32> to vector<2x192xf32>
      %109 = arith.addf %106, %108 : vector<2x192xf32>
      %c1_73 = arith.constant 1 : index
      %c0_74 = arith.constant 0 : index
      %c0_75 = arith.constant 0 : index
      %110 = vector.load %arg7[%c1_73, %c0_74, %c0_75] : memref<2x2x64xf32, #tpu.memory_space<vmem>>, vector<1x2x64xf32>
      %111 = vector.shape_cast %110 : vector<1x2x64xf32> to vector<2x64xf32>
      %c0_76 = arith.constant 0 : index
      %c0_77 = arith.constant 0 : index
      %112 = vector.load %arg14[%c0_76, %c0_77] : memref<64x192xf32, #tpu.memory_space<vmem>>, vector<64x192xf32>
      %cst_78 = arith.constant dense<0.000000e+00> : vector<2x192xf32>
      %113 = tpu.matmul %111, %112, %cst_78 {dimension_numbers = #tpu.dot_dimension_numbers<[1], [0], [0], [1], [0, 0, 1, 1], [], []>} : vector<2x64xf32>, vector<64x192xf32>, vector<2x192xf32> -> vector<2x192xf32>
      %c0_79 = arith.constant 0 : index
      %c0_80 = arith.constant 0 : index
      %114 = vector.load %arg16[%c0_79, %c0_80] : memref<1x192xf32, #tpu.memory_space<vmem>>, vector<1x192xf32>
      %115 = vector.broadcast %114 : vector<1x192xf32> to vector<2x192xf32>
      %116 = arith.addf %113, %115 : vector<2x192xf32>
      %c1_81 = arith.constant 1 : index
      %c0_82 = arith.constant 0 : index
      %c0_83 = arith.constant 0 : index
      %117 = vector.load %arg7[%c1_81, %c0_82, %c0_83] : memref<2x2x64xf32, #tpu.memory_space<vmem>>, vector<1x2x64xf32>
      %118 = vector.shape_cast %117 : vector<1x2x64xf32> to vector<2x64xf32>
      %119 = vector.extract_strided_slice %109 {offsets = [0, 0], sizes = [2, 64], strides = [1, 1]} : vector<2x192xf32> to vector<2x64xf32>
      %120 = vector.extract_strided_slice %116 {offsets = [0, 0], sizes = [2, 64], strides = [1, 1]} : vector<2x192xf32> to vector<2x64xf32>
      %121 = arith.addf %119, %120 : vector<2x64xf32>
      %cst_84 = arith.constant 0.000000e+00 : f32
      %122 = vector.broadcast %cst_84 : f32 to vector<2x64xf32>
      %123 = arith.subf %122, %121 : vector<2x64xf32>
      %124 = math.exp %123 : vector<2x64xf32>
      %cst_85 = arith.constant 1.000000e+00 : f32
      %125 = vector.broadcast %cst_85 : f32 to vector<2x64xf32>
      %126 = arith.addf %125, %124 : vector<2x64xf32>
      %cst_86 = arith.constant 1.000000e+00 : f32
      %127 = vector.broadcast %cst_86 : f32 to vector<2x64xf32>
      %128 = arith.divf %127, %126 : vector<2x64xf32>
      %129 = vector.extract_strided_slice %109 {offsets = [0, 64], sizes = [2, 64], strides = [1, 1]} : vector<2x192xf32> to vector<2x64xf32>
      %130 = vector.extract_strided_slice %116 {offsets = [0, 64], sizes = [2, 64], strides = [1, 1]} : vector<2x192xf32> to vector<2x64xf32>
      %131 = arith.addf %129, %130 : vector<2x64xf32>
      %cst_87 = arith.constant 0.000000e+00 : f32
      %132 = vector.broadcast %cst_87 : f32 to vector<2x64xf32>
      %133 = arith.subf %132, %131 : vector<2x64xf32>
      %134 = math.exp %133 : vector<2x64xf32>
      %cst_88 = arith.constant 1.000000e+00 : f32
      %135 = vector.broadcast %cst_88 : f32 to vector<2x64xf32>
      %136 = arith.addf %135, %134 : vector<2x64xf32>
      %cst_89 = arith.constant 1.000000e+00 : f32
      %137 = vector.broadcast %cst_89 : f32 to vector<2x64xf32>
      %138 = arith.divf %137, %136 : vector<2x64xf32>
      %139 = vector.extract_strided_slice %109 {offsets = [0, 128], sizes = [2, 64], strides = [1, 1]} : vector<2x192xf32> to vector<2x64xf32>
      %140 = vector.extract_strided_slice %116 {offsets = [0, 128], sizes = [2, 64], strides = [1, 1]} : vector<2x192xf32> to vector<2x64xf32>
      %141 = arith.mulf %128, %140 : vector<2x64xf32>
      %142 = arith.addf %139, %141 : vector<2x64xf32>
      %143 = math.tanh %142 : vector<2x64xf32>
      %cst_90 = arith.constant 1.000000e+00 : f32
      %144 = vector.broadcast %cst_90 : f32 to vector<2x64xf32>
      %145 = arith.subf %144, %138 : vector<2x64xf32>
      %146 = arith.mulf %145, %143 : vector<2x64xf32>
      %147 = arith.mulf %138, %118 : vector<2x64xf32>
      %148 = arith.addf %146, %147 : vector<2x64xf32>
      %c1_91 = arith.constant 1 : index
      %c0_92 = arith.constant 0 : index
      %c0_93 = arith.constant 0 : index
      %149 = vector.load %arg22[%c1_91, %c0_92, %c0_93] : memref<2x2x64xf32, #tpu.memory_space<vmem>>, vector<1x2x64xf32>
      %150 = vector.shape_cast %149 : vector<1x2x64xf32> to vector<2x64xf32>
      %151 = vector.shape_cast %148 : vector<2x64xf32> to vector<1x2x64xf32>
      tpu.vector_store %arg22[%c1_91, %c0_92, %c0_93], %151 {strides = array<i32>} : memref<2x2x64xf32, #tpu.memory_space<vmem>>, vector<1x2x64xf32>,
      %c0_94 = arith.constant 0 : index
      %c0_95 = arith.constant 0 : index
      %152 = vector.load %arg17[%c0_94, %c0_95] : memref<64x1024xf32, #tpu.memory_space<vmem>>, vector<64x1024xf32>
      %cst_96 = arith.constant dense<0.000000e+00> : vector<2x1024xf32>
      %153 = tpu.matmul %148, %152, %cst_96 {dimension_numbers = #tpu.dot_dimension_numbers<[1], [0], [0], [1], [0, 0, 1, 1], [], []>} : vector<2x64xf32>, vector<64x1024xf32>, vector<2x1024xf32> -> vector<2x1024xf32>
      %c0_97 = arith.constant 0 : index
      %c0_98 = arith.constant 0 : index
      %154 = vector.load %arg18[%c0_97, %c0_98] : memref<1x1024xf32, #tpu.memory_space<vmem>>, vector<1x1024xf32>
      %155 = vector.broadcast %154 : vector<1x1024xf32> to vector<2x1024xf32>
      %156 = arith.addf %153, %155 : vector<2x1024xf32>
      %cst_99 = arith.constant 0.000000e+00 : f32
      %157 = vector.broadcast %cst_99 : f32 to vector<2x1024xf32>
      %158 = arith.maximumf %156, %157 : vector<2x1024xf32>
      %c0_100 = arith.constant 0 : index
      %c0_101 = arith.constant 0 : index
      %159 = vector.load %arg25[%c0_100, %c0_101] : memref<2x1024xf32, #tpu.memory_space<vmem>>, vector<2x1024xf32>
      tpu.vector_store %arg25[%c0_100, %c0_101], %158 {strides = array<i32>} : memref<2x1024xf32, #tpu.memory_space<vmem>>, vector<2x1024xf32>,
    } else {
    }
    %c0 = arith.constant 0 : index
    %c0_1 = arith.constant 0 : index
    %3 = vector.load %arg25[%c0, %c0_1] : memref<2x1024xf32, #tpu.memory_space<vmem>>, vector<2x1024xf32>
    %c0_2 = arith.constant 0 : index
    %c0_3 = arith.constant 0 : index
    %4 = vector.load %arg19[%c0_2, %c0_3] : memref<1024x128xf32, #tpu.memory_space<vmem>>, vector<1024x128xf32>
    %cst = arith.constant dense<0.000000e+00> : vector<2x128xf32>
    %5 = tpu.matmul %3, %4, %cst {dimension_numbers = #tpu.dot_dimension_numbers<[1], [0], [0], [1], [0, 0, 1, 1], [], []>} : vector<2x1024xf32>, vector<1024x128xf32>, vector<2x128xf32> -> vector<2x128xf32>
    %c0_4 = arith.constant 0 : index
    %c0_5 = arith.constant 0 : index
    %6 = vector.load %arg20[%c0_4, %c0_5] : memref<1x128xf32, #tpu.memory_space<vmem>>, vector<1x128xf32>
    %7 = vector.broadcast %6 : vector<1x128xf32> to vector<2x128xf32>
    %8 = arith.addf %5, %7 : vector<2x128xf32>
    %c0_6 = arith.constant 0 : index
    %c0_7 = arith.constant 0 : index
    %9 = vector.load %arg21[%c0_6, %c0_7] : memref<2x128xf32, #tpu.memory_space<vmem>>, vector<2x128xf32>
    tpu.vector_store %arg21[%c0_6, %c0_7], %8 {strides = array<i32>} : memref<2x128xf32, #tpu.memory_space<vmem>>, vector<2x128xf32>,
    return
  }
  func.func @transform_0(%arg0: i32) -> i32 {
    %c0_i32 = arith.constant 0 : i32
    %c0_i32_0 = arith.constant 0 : i32
    return %c0_i32 : i32
  }
  func.func @transform_2(%arg0: i32) -> (i32, i32) {
    %c0_i32 = arith.constant 0 : i32
    %c0_i32_0 = arith.constant 0 : i32
    %c0_i32_1 = arith.constant 0 : i32
    return %c0_i32, %c0_i32_0 : i32, i32
  }
  func.func @transform_3(%arg0: i32) -> (i32, i32) {
    %c0_i32 = arith.constant 0 : i32
    %c0_i32_0 = arith.constant 0 : i32
    %c0_i32_1 = arith.constant 0 : i32
    return %c0_i32, %c0_i32_0 : i32, i32
  }
  func.func @transform_4(%arg0: i32) -> (i32, i32) {
    %c0_i32 = arith.constant 0 : i32
    %c0_i32_0 = arith.constant 0 : i32
    %c0_i32_1 = arith.constant 0 : i32
    return %c0_i32, %c0_i32_0 : i32, i32
  }
  func.func @transform_5(%arg0: i32) -> (i32, i32) {
    %c0_i32 = arith.constant 0 : i32
    %c0_i32_0 = arith.constant 0 : i32
    %c0_i32_1 = arith.constant 0 : i32
    return %c0_i32, %c0_i32_0 : i32, i32
  }
  func.func @transform_6(%arg0: i32) -> (i32, i32, i32) {
    %c0_i32 = arith.constant 0 : i32
    %c0_i32_0 = arith.constant 0 : i32
    %c0_i32_1 = arith.constant 0 : i32
    %c0_i32_2 = arith.constant 0 : i32
    return %c0_i32, %c0_i32_0, %c0_i32_1 : i32, i32, i32
  }
  func.func @transform_7(%arg0: i32) -> (i32, i32) {
    %c0_i32 = arith.constant 0 : i32
    %c0_i32_0 = arith.constant 0 : i32
    %c0_i32_1 = arith.constant 0 : i32
    return %c0_i32, %c0_i32_0 : i32, i32
  }
  func.func @transform_8(%arg0: i32) -> (i32, i32) {
    %c0_i32 = arith.constant 0 : i32
    %c0_i32_0 = arith.constant 0 : i32
    %c0_i32_1 = arith.constant 0 : i32
    return %c0_i32, %c0_i32_0 : i32, i32
  }
  func.func @transform_9(%arg0: i32) -> (i32, i32) {
    %c0_i32 = arith.constant 0 : i32
    %c0_i32_0 = arith.constant 0 : i32
    %c0_i32_1 = arith.constant 0 : i32
    return %c0_i32, %c0_i32_0 : i32, i32
  }
  func.func @transform_10(%arg0: i32) -> (i32, i32) {
    %c0_i32 = arith.constant 0 : i32
    %c0_i32_0 = arith.constant 0 : i32
    %c0_i32_1 = arith.constant 0 : i32
    return %c0_i32, %c0_i32_0 : i32, i32
  }
  func.func @transform_11(%arg0: i32) -> (i32, i32) {
    %c0_i32 = arith.constant 0 : i32
    %c0_i32_0 = arith.constant 0 : i32
    %c0_i32_1 = arith.constant 0 : i32
    return %c0_i32, %c0_i32_0 : i32, i32
  }
  func.func @transform_12(%arg0: i32) -> (i32, i32) {
    %c0_i32 = arith.constant 0 : i32
    %c0_i32_0 = arith.constant 0 : i32
    %c0_i32_1 = arith.constant 0 : i32
    return %c0_i32, %c0_i32_0 : i32, i32
  }
  func.func @transform_13(%arg0: i32) -> (i32, i32) {
    %c0_i32 = arith.constant 0 : i32
    %c0_i32_0 = arith.constant 0 : i32
    %c0_i32_1 = arith.constant 0 : i32
    return %c0_i32, %c0_i32_0 : i32, i32
  }
  func.func @transform_14(%arg0: i32) -> (i32, i32) {
    %c0_i32 = arith.constant 0 : i32
    %c0_i32_0 = arith.constant 0 : i32
    %c0_i32_1 = arith.constant 0 : i32
    return %c0_i32, %c0_i32_0 : i32, i32
  }
  func.func @transform_15(%arg0: i32) -> (i32, i32) {
    %c0_i32 = arith.constant 0 : i32
    %c0_i32_0 = arith.constant 0 : i32
    %c0_i32_1 = arith.constant 0 : i32
    return %c0_i32, %c0_i32_0 : i32, i32
  }
  func.func @transform_16(%arg0: i32) -> (i32, i32) {
    %c0_i32 = arith.constant 0 : i32
    %c0_i32_0 = arith.constant 0 : i32
    %c0_i32_1 = arith.constant 0 : i32
    return %c0_i32, %c0_i32_0 : i32, i32
  }
  func.func @transform_17(%arg0: i32) -> (i32, i32) {
    %c0_i32 = arith.constant 0 : i32
    %c0_i32_0 = arith.constant 0 : i32
    %c0_i32_1 = arith.constant 0 : i32
    return %c0_i32, %c0_i32_0 : i32, i32
  }
  func.func @transform_18(%arg0: i32) -> (i32, i32) {
    %c0_i32 = arith.constant 0 : i32
    %c0_i32_0 = arith.constant 0 : i32
    return %c0_i32, %arg0 : i32, i32
  }
  func.func @transform_19(%arg0: i32) -> (i32, i32) {
    %c0_i32 = arith.constant 0 : i32
    %c0_i32_0 = arith.constant 0 : i32
    return %c0_i32, %arg0 : i32, i32
  }
  func.func @transform_20(%arg0: i32) -> (i32, i32) {
    %c0_i32 = arith.constant 0 : i32
    %c0_i32_0 = arith.constant 0 : i32
    return %c0_i32, %arg0 : i32, i32
  }
  func.func @transform_21(%arg0: i32) -> (i32, i32, i32) {
    %c0_i32 = arith.constant 0 : i32
    %c0_i32_0 = arith.constant 0 : i32
    %c0_i32_1 = arith.constant 0 : i32
    %c0_i32_2 = arith.constant 0 : i32
    return %c0_i32, %c0_i32_0, %c0_i32_1 : i32, i32, i32
  }
}

</mosaic_0001>

<bundles_post_ra>
// kernel: tpu_custom_call.1
= control target key start
LH: loop header
LB: loop body
LE: loop exit
PB: predicated region body
PF: predicated region fallthrough
CT: control target
= control target key end

     0   :  { %s2923_s0 = inlined_call_operand.hbm [shape: s32[2], index: 0, kind: input, shape index: {}]   ;;  %s2924_s1 = inlined_call_operand.vmem [shape: f32[128,32], index: 1, kind: input, shape index: {}]   ;;  %s2925_s2 = inlined_call_operand.hbm [shape: f32[16,64], index: 2, kind: input, shape index: {}]   ;;  %s2926_s3 = inlined_call_operand.hbm [shape: f32[16,32], index: 3, kind: input, shape index: {}]   ;;  %s2927_s4 = inlined_call_operand.vmem [shape: f32[64,32], index: 4, kind: input, shape index: {}]   ;;  %s2928_s5 = inlined_call_operand.hbm [shape: f32[1,32], index: 5, kind: input, shape index: {}]   ;;  %s2929_s6 = inlined_call_operand.hbm [shape: f32[2,2,64], index: 6, kind: input, shape index: {}]   ;;  %s2930_s7 = inlined_call_operand.hbm [shape: f32[32,192], index: 7, kind: input, shape index: {}]   ;;  %s2931_s8 = inlined_call_operand.vmem [shape: f32[64,192], index: 8, kind: input, shape index: {}]   ;;  %s2932_s9 = inlined_call_operand.vmem [shape: f32[64,192], index: 9, kind: input, shape index: {}]   ;;  %s2933_s10 = inlined_call_operand.vmem [shape: f32[1,192], index: 10, kind: input, shape index: {}]   ;;  %s2934_s11 = inlined_call_operand.vmem [shape: f32[1,192], index: 11, kind: input, shape index: {}]   ;;  %s2935_s12 = inlined_call_operand.hbm [shape: f32[64,192], index: 12, kind: input, shape index: {}]   ;;  %s2936_s13 = inlined_call_operand.hbm [shape: f32[64,192], index: 13, kind: input, shape index: {}]   ;;  %s2937_s14 = inlined_call_operand.vmem [shape: f32[1,192], index: 14, kind: input, shape index: {}]   ;;  %s2938_s15 = inlined_call_operand.vmem [shape: f32[1,192], index: 15, kind: input, shape index: {}]   ;;  %s2939_s16 = inlined_call_operand.hbm [shape: f32[64,1024], index: 16, kind: input, shape index: {}]   ;;  %s2940_s17 = inlined_call_operand.vmem [shape: f32[1,1024], index: 17, kind: input, shape index: {}]   ;;  %s2941_s18 = inlined_call_operand.hbm [shape: f32[1024,128], index: 18, kind: input, shape index: {}]   ;;  %s2942_s19 = inlined_call_operand.vmem [shape: f32[1,128], index: 19, kind: input, shape index: {}]   ;;  %s2943_s20 = inlined_call_operand.hbm [shape: f32[2,128], index: 20, kind: output, shape index: {0}]   ;;  %s2944_s21 = inlined_call_operand.hbm [shape: f32[2,2,64], index: 21, kind: output, shape index: {1}]  }
   0x1   :  { %2953 = sst [smem:[#allocation37_spill]] %s2923_s0 }
   0x2   :  { %2954 = sst [smem:[#allocation38_spill]] %s2924_s1 }
   0x3   :  { %2955 = sst [smem:[#allocation39_spill]] %s2925_s2 }
   0x4   :  { %2956 = sst [smem:[#allocation40_spill]] %s2926_s3 }
   0x5   :  { %2957 = sst [smem:[#allocation41_spill]] %s2927_s4 }
   0x6   :  { %2958 = sst [smem:[#allocation42_spill]] %s2928_s5 }
   0x7   :  { %27 = vsyncpa [#allocation8], 0 }
   0x8   :  { %28 = vsyncpa [#allocation6], 0 }
   0x9   :  { %29 = vsyncpa [#allocation11], 0 }
   0xa   :  { %30 = vsyncpa [#allocation14], 0 }
   0xb   :  { %31 = vsyncpa [#allocation17], 0 }
   0xc   :  { %32 = vsyncpa [#allocation20], 0 }
   0xd   :  { %33 = vsyncpa [#allocation7], 0 }
   0xe   :  { %34 = vsyncpa [#allocation24], 0  ;;  %s2480_s2 = smov [#allocation10]   ;;  %s2481_s26 = smov [#allocation13]  }
   0xf   :  { %s60_s25 = sshll.u32 %s2480_s2, 4  ;;  %s84_s27 = sshll.u32 %s2481_s26, 4  ;;  %s61_s25 = int_to_ptr.vmem [resolvable:$true] %s60_s25  ;;  %s85_s27 = int_to_ptr.vmem [resolvable:$true] %s84_s27 }
  0x10   :  { %s2240_s3 = scalar_lea.vmem %s61_s25, 256  ;;  %p2245_p1 = scmp.lt.s32.totalorder %s61_s25, %s61_s25 }
  0x11   :  { %p2241_p0 = scmp.ne.s32.totalorder %s61_s25, %s2240_s3  ;;  %p2246_p2 = scmp.lt.s32.totalorder %s2240_s3, %s2240_s3 }
  0x13   :  { %p2247_p3 = por %p2246_p2, %p2245_p1 }
  0x15   :  { %p2248_p4 = pnand %p2247_p3, %p2241_p0 }
  0x17   :  { %2251 = shalt.err (!%p2248_p4)
}
  0x18   :  { %s2949_s28 = smov 128   ;;  %s2483_s29 = smov 8  }
  0x19   :  { %s2959_s30 = sld [smem:[#allocation40_spill]]  ;;  %s2260_s5 = scalar_lea.vmem %s85_s27, 64 }
  0x1a   :  { %p2261_p5 = scmp.ne.s32.totalorder %s85_s27, %s2260_s5  ;;  %p2265_p6 = scmp.lt.s32.totalorder %s85_s27, %s85_s27 }
  0x1b   :  { %p2266_p7 = scmp.lt.s32.totalorder %s2260_s5, %s2260_s5 }
  0x1d   :  { %p2267_p8 = por %p2266_p7, %p2265_p6 }
  0x1f   :  { %66 = dma.hbm_to_vmem [thread:$0]  %s2959_s30, 256, %s61_s25, [#allocation11], %s2949_s28, %s2949_s28, %s2483_s29  }
  0x20   :  { %p2268_p9 = pnand %p2267_p8, %p2261_p5 }
  0x22   :  { %2271 = shalt.err (!%p2268_p9)
}
  0x23   :  { %s2947_s22 = smov 32   ;;  %s2948_s23 = smov 2  }
  0x24   :  { %90 = dma.hbm_to_vmem [thread:$0]  %s2929_s6, 64, %s85_s27, [#allocation14], %s2947_s22, %s2947_s22, %s2948_s23  }
  0x25   :  { %s2486_s2 = smov [#allocation16]   ;;  %s2487_s3 = smov [#allocation19]  }
  0x26   :  { %s116_s26 = sshll.u32 %s2486_s2, 4  ;;  %s144_s25 = sshll.u32 %s2487_s3, 4  ;;  %s117_s26 = int_to_ptr.vmem [resolvable:$true] %s116_s26  ;;  %s145_s25 = int_to_ptr.vmem [resolvable:$true] %s144_s25 }
  0x27   :  { %s2280_s0 = scalar_lea.vmem %s117_s26, 2048  ;;  %p2285_p11 = scmp.lt.s32.totalorder %s117_s26, %s117_s26 }
  0x28   :  { %p2281_p10 = scmp.ne.s32.totalorder %s117_s26, %s2280_s0  ;;  %p2286_p12 = scmp.lt.s32.totalorder %s2280_s0, %s2280_s0 }
  0x2a   :  { %p2287_p13 = por %p2286_p12, %p2285_p11 }
  0x2c   :  { %p2288_p0 = pnand %p2287_p13, %p2281_p10 }
  0x2e   :  { %2291 = shalt.err (!%p2288_p0)
}
  0x2f   :  { %s2488_s4 = smov 256   ;;  %s2489_s30 = smov 16  }
  0x30   :  { %122 = dma.hbm_to_vmem [thread:$0]  %s2935_s12, 2048, %s117_s26, [#allocation17], %s2488_s4, %s2488_s4, %s2489_s30  }
  0x31   :  { %s2300_s27 = scalar_lea.vmem %s145_s25, 8192  ;;  %p2305_p2 = scmp.lt.s32.totalorder %s145_s25, %s145_s25 }
  0x32   :  { %p2301_p1 = scmp.ne.s32.totalorder %s145_s25, %s2300_s27  ;;  %p2306_p3 = scmp.lt.s32.totalorder %s2300_s27, %s2300_s27 }
  0x34   :  { %p2307_p4 = por %p2306_p3, %p2305_p2 }
  0x36   :  { %p2308_p5 = pnand %p2307_p4, %p2301_p1 }
  0x38   :  { %2311 = shalt.err (!%p2308_p5)
}
  0x39   :  { %s2490_s1 = smov 1024   ;;  %s2951_s24 = smov 64  }
  0x3a   :  { %150 = dma.hbm_to_vmem [thread:$0]  %s2939_s16, 8192, %s145_s25, [#allocation20], %s2490_s1, %s2490_s1, %s2951_s24  }
  0x3b   :  { %s2492_s0 = smov [#allocation5]   ;;  %s2960_s28 = sld [smem:[#allocation37_spill]] }
  0x3c   :  { %s2493_s12 = smov [#allocation9]   ;;  %s2494_s5 = smov [#allocation12]  }
  0x3d   :  { %s48_s26 = sshll.u32 %s2493_s12, 4  ;;  %s75_s6 = sshll.u32 %s2494_s5, 4  ;;  %s49_s26 = int_to_ptr.vmem [resolvable:$true] %s48_s26  ;;  %s76_s6 = int_to_ptr.vmem [resolvable:$true] %s75_s6 }
  0x3e   :  { %s2328_s27 = scalar_lea.vmem %s49_s26, 256  ;;  %p2333_p7 = scmp.lt.s32.totalorder %s49_s26, %s49_s26 }
  0x3f   :  { %p2329_p6 = scmp.ne.s32.totalorder %s49_s26, %s2328_s27  ;;  %p2334_p8 = scmp.lt.s32.totalorder %s2328_s27, %s2328_s27 }
  0x41   :  { %42 = dma.hbm_to_smem %s2960_s28, 16, %s2492_s0, [#allocation8]  }
  0x42   :  { %p2335_p9 = por %p2334_p8, %p2333_p7 }
  0x44   :  { %p2336_p10 = pnand %p2335_p9, %p2329_p6 }
  0x46   :  { %2339 = shalt.err (!%p2336_p10)
}
  0x47   :  { %s2961_s2 = smov 128   ;;  %s2962_s1 = sld [smem:[#allocation39_spill]] }
  0x48   :  { %s2348_s28 = scalar_lea.vmem %s76_s6, 16  ;;  %s2352_s22 = scalar_lea.vmem %s76_s6, 32 }
  0x49   :  { %p2349_p11 = scmp.ne.s32.totalorder %s76_s6, %s2348_s28  ;;  %p2353_p12 = scmp.lt.s32.totalorder %s76_s6, %s76_s6 }
  0x4a   :  { %p2354_p13 = scmp.lt.s32.totalorder %s2352_s22, %s2348_s28 }
  0x4c   :  { %p2355_p0 = por %p2354_p13, %p2353_p12 }
  0x4d   :  { %54 = dma.hbm_to_vmem [thread:$0]  %s2962_s1, 256, %s49_s26, [#allocation6], %s2961_s2, %s2961_s2, %s2483_s29  }
  0x4e   :  { %p2356_p1 = pnand %p2355_p0, %p2349_p11 }
  0x50   :  { %2359 = shalt.err (!%p2356_p1)
}
  0x51   :  { %s2963_s0 = sld [smem:[#allocation42_spill]]  ;;  %s2495_s12 = smov [#allocation15]  }
  0x52   :  { %s96_s5 = sshll.u32 %s2495_s12, 4  ;;  %s2496_s27 = smov [#allocation18]   ;;  %s97_s5 = int_to_ptr.vmem [resolvable:$true] %s96_s5 }
  0x53   :  { %s128_s24 = sshll.u32 %s2496_s27, 4  ;;  %s2368_s16 = scalar_lea.vmem %s97_s5, 1024  ;;  %s129_s24 = int_to_ptr.vmem [resolvable:$true] %s128_s24 }
  0x54   :  { %p2369_p2 = scmp.ne.s32.totalorder %s97_s5, %s2368_s16  ;;  %p2373_p3 = scmp.lt.s32.totalorder %s97_s5, %s97_s5 }
  0x55   :  { %p2374_p4 = scmp.lt.s32.totalorder %s2368_s16, %s2368_s16 }
  0x57   :  { %78 = dma.hbm_to_vmem [thread:$0]  %s2963_s0, 16, %s76_s6, [#allocation11]  }
  0x58   :  { %p2375_p5 = por %p2374_p4, %p2373_p3 }
  0x5a   :  { %p2376_p6 = pnand %p2375_p5, %p2369_p2 }
  0x5c   :  { %2379 = shalt.err (!%p2376_p6)
}
  0x5d   :  { %102 = dma.hbm_to_vmem [thread:$0]  %s2930_s7, 1024, %s97_s5, [#allocation14], %s2488_s4, %s2488_s4, %s2489_s30  }
  0x5e   :  { %s2388_s6 = scalar_lea.vmem %s129_s24, 2048  ;;  %p2393_p8 = scmp.lt.s32.totalorder %s129_s24, %s129_s24 }
  0x5f   :  { %p2389_p7 = scmp.ne.s32.totalorder %s129_s24, %s2388_s6  ;;  %p2394_p9 = scmp.lt.s32.totalorder %s2388_s6, %s2388_s6 }
  0x61   :  { %p2395_p10 = por %p2394_p9, %p2393_p8 }
  0x63   :  { %p2396_p11 = pnand %p2395_p10, %p2389_p7 }
  0x65   :  { %2399 = shalt.err (!%p2396_p11)
}
  0x66   :  { %134 = dma.hbm_to_vmem [thread:$0]  %s2936_s13, 2048, %s129_s24, [#allocation17], %s2488_s4, %s2488_s4, %s2489_s30  }
  0x67   :  { %s2497_s22 = smov [#allocation21]  }
  0x68   :  { %s158_s23 = sshll.u32 %s2497_s22, 4  ;;  %s159_s23 = int_to_ptr.vmem [resolvable:$true] %s158_s23 }
  0x69   :  { %s2408_s3 = scalar_lea.vmem %s159_s23, 16384  ;;  %p2413_p13 = scmp.lt.s32.totalorder %s159_s23, %s159_s23 }
  0x6a   :  { %p2409_p12 = scmp.ne.s32.totalorder %s159_s23, %s2408_s3  ;;  %p2414_p0 = scmp.lt.s32.totalorder %s2408_s3, %s2408_s3 }
  0x6c   :  { %p2415_p1 = por %p2414_p0, %p2413_p13 }
  0x6e   :  { %p2416_p2 = pnand %p2415_p1, %p2409_p12 }
  0x70   :  { %2419 = shalt.err (!%p2416_p2)
}
  0x71   :  { %164 = dma.hbm_to_vmem [thread:$0]  %s2941_s18, 16384, %s159_s23, [#allocation20], %s2961_s2, %s2961_s2, %s2483_s29  }
  0x72   :  { %2460 = dma.done.wait [#allocation8], 16  }
  0x73   :  { %2461 = vsyncadd [#allocation8], 4294967280 }
  0x74   :  { %2462 = dma.done.wait [#allocation6], 256  }
  0x75   :  { %2463 = vsyncadd [#allocation6], 4294967040 }
  0x76   :  { %2464 = dma.done.wait [#allocation11], 272  }
  0x77   :  { %2465 = vsyncadd [#allocation11], 4294967024 }
  0x78   :  { %2466 = dma.done.wait [#allocation14], 1088  }
  0x79   :  { %2467 = vsyncadd [#allocation14], 4294966208 }
  0x7a   :  { %2468 = dma.done.wait [#allocation17], 4096  }
  0x7b   :  { %2469 = vsyncadd [#allocation17], 4294963200 }
  0x7c   :  { %2470 = dma.done.wait [#allocation20], 24576  }
  0x7d   :  { %2471 = vsyncadd [#allocation20], 4294942720 }
  0x7e   :  { %197 = sfence }
  0x7f   :  { %s202_s13 = sld [smem:[#allocation5]] }
  0x80   :  { %s2964_s24 = sld [smem:[#allocation38_spill]] }
  0x86   :  { %s203_s12 = scalar_lea.vmem %s2964_s24, %s202_s13 }
  0x87   :  { %v222_v0 = vld [vmem:[%s203_s12] sm:$0x1] }
  0x88   :  { %223 = vst [vmem:[#allocation2] sm:$0x1] %v222_v0 }
  0x89   :  { %249 = vsyncadd [#allocation3], 16  ;;  %s1999_s18 = sld [smem:[#allocation5 + $0x1]] }
  0x8f   :  { %s251_s5 = scalar_lea.vmem %s2964_s24, %s1999_s18 }
  0x90   :  { %v272_v1 = vld [vmem:[%s251_s5] sm:$0x1] }
  0x91   :  { %273 = vst [vmem:[#allocation2 + $0x1] sm:$0x1] %v272_v1 }
  0x92   :  { %299 = vsyncadd [#allocation3 + $0x1], 16  ;;  %s2965_s26 = sld [smem:[#allocation41_spill]]  ;;  %vm312_vm0 = vcmask 523264   ;;  %v2679_v5 = vld [vmem:[#allocation9] sm:$0xff]  ;;  %v2698_v11 = vld [vmem:[#allocation9 + $0x8] sm:$0xff] }
  0x93   :  { %2183 = vmatprep.mubr.msk.f32.mxu0 %vm312_vm0, %v2679_v5  ;;  %v311_v12 = vld [vmem:[#allocation10 + $0x8] sm:$0xff]  ;;  %v310_v14 = vld [vmem:[#allocation10] sm:$0xff]  ;;  %v2002_v20 = vld [vmem:[#allocation12] ss:$0 sm:$0xff]  ;;  %vm405_vm1 = vcmask 261120  }
  0x98   :  { %v309_v2 = vld [vmem:[%s2965_s26 + $0x38] sm:$0xff]  ;;  %v308_v3 = vld [vmem:[%s2965_s26 + $0x30] sm:$0xff]  ;;  %v307_v4 = vld [vmem:[%s2965_s26 + $0x28] sm:$0xff] }
  0x99   :  { %2167 = vmatprep.subr.mxu0 %v309_v2  ;;  %v306_v6 = vld [vmem:[%s2965_s26 + $0x20] sm:$0xff]  ;;  %v305_v7 = vld [vmem:[%s2965_s26 + $0x18] sm:$0xff]  ;;  %v304_v8 = vld [vmem:[%s2965_s26 + $0x10] sm:$0xff] }
  0x9a   :  { %2168 = vmatpush3.msra.mxu0 %v309_v2  ;;  %v303_v9 = vld [vmem:[%s2965_s26 + $0x8] sm:$0xff]  ;;  %v302_v10 = vld [vmem:[%s2965_s26] sm:$0xff] }
  0x9b   :  { %2169 = vmatprep.subr.mxu0 %v308_v3 }
  0x9c   :  { %2170 = vmatpush3.msra.mxu0 %v308_v3 }
  0x9d   :  { %2171 = vmatprep.subr.mxu0 %v307_v4 }
  0x9e   :  { %2172 = vmatpush3.msra.mxu0 %v307_v4 }
  0x9f   :  { %2173 = vmatprep.subr.mxu0 %v306_v6 }
  0xa0   :  { %2174 = vmatpush3.msra.mxu0 %v306_v6 }
  0xa1   :  { %2175 = vmatprep.subr.mxu0 %v305_v7 }
  0xa2   :  { %2176 = vmatpush3.msra.mxu0 %v305_v7 }
  0xa3   :  { %2177 = vmatprep.subr.mxu0 %v304_v8 }
  0xa4   :  { %2178 = vmatpush3.msra.mxu0 %v304_v8 }
  0xa5   :  { %2179 = vmatprep.subr.mxu0 %v303_v9 }
  0xa6   :  { %2180 = vmatpush3.msra.mxu0 %v303_v9 }
  0xa7   :  { %2181 = vmatprep.subr.mxu0 %v302_v10 }
  0xa8   :  { %2182 = vmatpush3.msra.mxu0 %v302_v10 }
  0xa9   :  { %2184 = vmatmul.mubr.msk.f32.vlgmr.msra.gmra.mxu0 %vm312_vm0, %v2698_v11 }
 0x169   :  { %v2185_v13 = vpop.f32.mrf.mxu0 }
 0x16a   :  { %v391_v15 = vadd.f32 %v2185_v13, %v311_v12 }
 0x16b   :  { %v385_v16 = vpop.f32.mrf.mxu0 }
 0x16c   :  { %v386_v17 = vadd.f32 %v385_v16, %v310_v14  ;;  %2208 = vtanh.f32 %v391_v15 }
 0x16e   :  { %2210 = vtanh.f32 %v386_v17 }
 0x179   :  { %v2209_v18 = vpop.eup %2208 }
 0x17a   :  { %v404_v23 = vmul.f32 %v2209_v18, %v2002_v20 }
 0x17b   :  { %v2211_v19 = vpop.eup %2210 }
 0x17c   :  { %v403_v21 = vmul.f32 %v2211_v19, %v2002_v20  ;;  %v409_v24 = vsel %vm405_vm1, %v404_v23, 0.0 }
 0x17e   :  { %v406_v22 = vsel %vm405_vm1, %v403_v21, 0.0 }
 0x17f   :  { %407 = vadd.xlane.f32.xlu0 %v406_v22 }
 0x183   :  { %410 = vadd.xlane.f32.xlu0 %v409_v24 }
 0x208   :  { %v408_v25 = vpop.xlane.xlu0 %407 }
 0x209   :  { %v412_v26 = vrot.slane %v408_v25, 4 }
 0x20b   :  { %v413_v27 = vmax.f32 %v408_v25, %v412_v26 }
 0x20c   :  { %v411_v28 = vpop.xlane.xlu0 %410 }
 0x20d   :  { %v414_v29 = vrot.slane %v413_v27, 2  ;;  %v418_v30 = vrot.slane %v411_v28, 4 }
 0x20f   :  { %v415_v31 = vmax.f32 %v413_v27, %v414_v29  ;;  %v419_v32 = vmax.f32 %v411_v28, %v418_v30 }
 0x211   :  { %v416_v33 = vrot.slane %v415_v31, 1  ;;  %v420_v34 = vrot.slane %v419_v32, 2 }
 0x213   :  { %v417_v35 = vmax.f32 %v415_v31, %v416_v33  ;;  %v421_v36 = vmax.f32 %v419_v32, %v420_v34 }
 0x215   :  { %v424_v37 = vsub.f32 %v408_v25, %v417_v35  ;;  %v422_v38 = vrot.slane %v421_v36, 1 }
 0x217   :  { %v426_v39 = vmul.f32 1.442695, %v424_v37  ;;  %v423_v40 = vmax.f32 %v421_v36, %v422_v38 }
 0x219   :  { %2212 = vpow2.f32 %v426_v39  ;;  %v425_v41 = vsub.f32 %v411_v28, %v423_v40 }
 0x21b   :  { %v428_v42 = vmul.f32 1.442695, %v425_v41 }
 0x21d   :  { %2214 = vpow2.f32 %v428_v42 }
 0x226   :  { %v2213_v43 = vpop.eup %2212 }
 0x227   :  { %v430_v44 = vrot.slane %v2213_v43, 4 }
 0x229   :  { %v431_v45 = vadd.f32 %v2213_v43, %v430_v44 }
 0x22a   :  { %v2215_v46 = vpop.eup %2214 }
 0x22b   :  { %v432_v47 = vrot.slane %v431_v45, 2  ;;  %v436_v48 = vrot.slane %v2215_v46, 4 }
 0x22d   :  { %v433_v49 = vadd.f32 %v432_v47, %v431_v45  ;;  %v437_v50 = vadd.f32 %v2215_v46, %v436_v48 }
 0x22f   :  { %v434_v51 = vrot.slane %v433_v49, 1  ;;  %v438_v52 = vrot.slane %v437_v50, 2 }
 0x231   :  { %v435_v53 = vadd.f32 %v434_v51, %v433_v49  ;;  %v439_v54 = vadd.f32 %v438_v52, %v437_v50 }
 0x233   :  { %2216 = vrcp.f32 %v435_v53  ;;  %v440_v55 = vrot.slane %v439_v54, 1 }
 0x235   :  { %v441_v56 = vadd.f32 %v440_v55, %v439_v54 }
 0x237   :  { %2218 = vrcp.f32 %v441_v56 }
 0x240   :  { %v2217_v57 = vpop.eup %2216 }
 0x241   :  { %v444_v58 = vmul.f32 %v2217_v57, %v2213_v43 }
 0x243   :  { %v446_v59 = vmul.f32 %v444_v58, %v2679_v5 }
 0x244   :  { %v2219_v60 = vpop.eup %2218 }
 0x245   :  { %v448_v61 = vsel %vm312_vm0, %v446_v59, 0.0  ;;  %v445_v62 = vmul.f32 %v2219_v60, %v2215_v46 }
 0x246   :  { %v449_v63 = vrot.slane %v448_v61, 4 }
 0x247   :  { %v447_v0 = vmul.f32 %v445_v62, %v2698_v11 }
 0x248   :  { %v450_v1 = vadd.f32 %v449_v63, %v448_v61 }
 0x249   :  { %v455_v2 = vsel %vm312_vm0, %v447_v0, 0.0 }
 0x24a   :  { %v451_v3 = vrot.slane %v450_v1, 2  ;;  %v456_v4 = vrot.slane %v455_v2, 4 }
 0x24c   :  { %v452_v6 = vadd.f32 %v451_v3, %v450_v1  ;;  %v457_v7 = vadd.f32 %v456_v4, %v455_v2 }
 0x24e   :  { %v453_v8 = vrot.slane %v452_v6, 1  ;;  %v458_v9 = vrot.slane %v457_v7, 2 }
 0x250   :  { %v454_v10 = vadd.f32 %v453_v8, %v452_v6  ;;  %v459_v12 = vadd.f32 %v458_v9, %v457_v7 }
 0x252   :  { %v460_v13 = vrot.slane %v459_v12, 1 }
 0x254   :  { %v461_v5 = vadd.f32 %v460_v13, %v459_v12 }
 0x255   :  { %2472 = dma.done.wait [#allocation3], 16 }
 0x256   :  { %2473 = vsyncadd [#allocation3], 4294967280 }
 0x257   :  { %2474 = dma.done.wait [#allocation3 + $0x1], 16 }
 0x258   :  { %2475 = vsyncadd [#allocation3 + $0x1], 4294967280  ;;  %v2498_v14 = vmov 0.0   ;;  %v491_v11 = vld [vmem:[%s2931_s8 + $0x78] sm:$0xff]  ;;  %v490_v15 = vld [vmem:[%s2931_s8 + $0x70] sm:$0xff]  ;;  %vm494_vm2 = vcmask 1041409   ;;  %v645_v57 = vlaneseq }
 0x259   :  { %562 = vmatprep.mubr.f32.mxu1 %v2498_v14  ;;  %636 = vmatprep.mubr.f32.mxu0 %v2498_v14  ;;  %v489_v16 = vld [vmem:[%s2931_s8 + $0x68] sm:$0xff]  ;;  %v488_v17 = vld [vmem:[%s2931_s8 + $0x60] sm:$0xff]  ;;  %v487_v18 = vld [vmem:[%s2931_s8 + $0x58] sm:$0xff]  ;;  %v495_v39 = vsel %vm494_vm2, %v461_v5, %v454_v10  ;;  %vm785_vm3 = vcmask 517120  }
 0x25a   :  { %514 = vmatprep.subr.mxu1 %v491_v11  ;;  %v486_v19 = vld [vmem:[%s2931_s8 + $0x50] sm:$0xff]  ;;  %v475_v20 = vld [vmem:[#allocation15 + $0x38] sm:$0xff]  ;;  %v474_v21 = vld [vmem:[#allocation15 + $0x30] sm:$0xff]  ;;  %v2815_v58 = vshrl.u32 %v645_v57, 7 }
 0x25b   :  { %515 = vmatpush1.msra.mxu1 %v490_v15  ;;  %v485_v22 = vld [vmem:[%s2931_s8 + $0x48] sm:$0xff]  ;;  %596 = vmatprep.subr.mxu0 %v475_v20  ;;  %v473_v23 = vld [vmem:[#allocation15 + $0x28] sm:$0xff]  ;;  %v484_v24 = vld [vmem:[%s2931_s8 + $0x40] sm:$0xff] }
 0x25c   :  { %516 = vmatprep.subr.mxu1 %v489_v16  ;;  %597 = vmatpush1.msra.mxu0 %v474_v21  ;;  %v472_v25 = vld [vmem:[#allocation15 + $0x20] sm:$0xff]  ;;  %v471_v26 = vld [vmem:[#allocation15 + $0x18] sm:$0xff]  ;;  %v483_v27 = vld [vmem:[%s2931_s8 + $0x38] sm:$0xff]  ;;  %v2818_v59 = vsub.s32 0, %v2815_v58  ;;  %v2829_v5 = vsub.s32 1, %v2815_v58 }
 0x25d   :  { %517 = vmatpush1.msra.mxu1 %v488_v17  ;;  %598 = vmatprep.subr.mxu0 %v473_v23  ;;  %v470_v28 = vld [vmem:[#allocation15 + $0x10] sm:$0xff]  ;;  %v482_v29 = vld [vmem:[%s2931_s8 + $0x30] sm:$0xff]  ;;  %v481_v31 = vld [vmem:[%s2931_s8 + $0x28] sm:$0xff] }
 0x25e   :  { %518 = vmatprep.subr.mxu1 %v487_v18  ;;  %599 = vmatpush1.msra.mxu0 %v472_v25  ;;  %v469_v30 = vld [vmem:[#allocation15 + $0x8] sm:$0xff]  ;;  %v468_v32 = vld [vmem:[#allocation15] sm:$0xff]  ;;  %v480_v33 = vld [vmem:[%s2931_s8 + $0x20] sm:$0xff] }
 0x25f   :  { %519 = vmatpush1.msra.mxu1 %v486_v19  ;;  %600 = vmatprep.subr.mxu0 %v471_v26  ;;  %v467_v34 = vld [vmem:[#allocation2] sm:$0x3]  ;;  %v479_v35 = vld [vmem:[%s2931_s8 + $0x18] sm:$0xff]  ;;  %v478_v36 = vld [vmem:[%s2931_s8 + $0x10] sm:$0xff] }
 0x260   :  { %520 = vmatprep.subr.mxu1 %v485_v22  ;;  %601 = vmatpush1.msra.mxu0 %v470_v28  ;;  %v477_v37 = vld [vmem:[%s2931_s8 + $0x8] sm:$0xff]  ;;  %v476_v38 = vld [vmem:[%s2931_s8] sm:$0xff]  ;;  %v673_v40 = vld [vmem:[%s2932_s9 + $0x78] sm:$0xff] }
 0x261   :  { %521 = vmatpush1.msra.mxu1 %v484_v24  ;;  %602 = vmatprep.subr.mxu0 %v469_v30  ;;  %v672_v41 = vld [vmem:[%s2932_s9 + $0x70] sm:$0xff]  ;;  %v671_v42 = vld [vmem:[%s2932_s9 + $0x68] sm:$0xff]  ;;  %v670_v43 = vld [vmem:[%s2932_s9 + $0x60] sm:$0xff] }
 0x262   :  { %522 = vmatprep.subr.mxu1 %v483_v27  ;;  %603 = vmatpush1.msra.mxu0 %v468_v32  ;;  %v669_v44 = vld [vmem:[%s2932_s9 + $0x58] sm:$0xff]  ;;  %v668_v45 = vld [vmem:[%s2932_s9 + $0x50] sm:$0xff]  ;;  %v667_v46 = vld [vmem:[%s2932_s9 + $0x48] sm:$0xff] }
 0x263   :  { %523 = vmatpush1.msra.mxu1 %v482_v29  ;;  %2004 = vmatmul.mubr.msk.f32.vlgmr.msra.gmra.mxu0 %vm405_vm1, %v467_v34  ;;  %v666_v47 = vld [vmem:[%s2932_s9 + $0x40] sm:$0xff]  ;;  %v665_v48 = vld [vmem:[%s2932_s9 + $0x38] sm:$0xff]  ;;  %v664_v49 = vld [vmem:[%s2932_s9 + $0x30] sm:$0xff] }
 0x264   :  { %524 = vmatprep.subr.mxu1 %v481_v31  ;;  %881 = vmatprep.mubr.f32.mxu0 %v2498_v14  ;;  %v663_v50 = vld [vmem:[%s2932_s9 + $0x28] sm:$0xff]  ;;  %v662_v51 = vld [vmem:[%s2932_s9 + $0x20] sm:$0xff]  ;;  %v661_v52 = vld [vmem:[%s2932_s9 + $0x18] sm:$0xff] }
 0x265   :  { %525 = vmatpush1.msra.mxu1 %v480_v33  ;;  %v660_v53 = vld [vmem:[%s2932_s9 + $0x10] sm:$0xff]  ;;  %v659_v54 = vld [vmem:[%s2932_s9 + $0x8] sm:$0xff]  ;;  %v658_v55 = vld [vmem:[%s2932_s9] sm:$0xff] }
 0x266   :  { %526 = vmatprep.subr.mxu1 %v479_v35  ;;  %v2810_v56 = vld [vmem:[#allocation13] sm:$0x3]  ;;  %v643_v62 = vld [vmem:[%s2933_s10] sm:$0x3]  ;;  %v904_v25 = vld [vmem:[#allocation18 + $0x70] sm:$0xff]  ;;  %s2966_s10 = smov 64  }
 0x267   :  { %527 = vmatpush1.msra.mxu1 %v478_v36  ;;  %v674_v63 = vld [vmem:[%s2934_s11] sm:$0x3]  ;;  %v648_v1 = vrot.slane %v643_v62, %v2818_v59  ;;  %v652_v18 = vrot.slane %v643_v62, %v2829_v5  ;;  %v903_v27 = vld [vmem:[#allocation18 + $0x68] sm:$0xff]  ;;  %v801_v28 = vld [vmem:[#allocation16 + $0x70] sm:$0xff] }
 0x268   :  { %528 = vmatprep.subr.mxu1 %v477_v37  ;;  %v679_v2 = vrot.slane %v674_v63, %v2818_v59  ;;  %v683_v15 = vrot.slane %v674_v63, %v2829_v5  ;;  %v905_v24 = vld [vmem:[#allocation18 + $0x78] sm:$0xff]  ;;  %v902_v29 = vld [vmem:[#allocation18 + $0x60] sm:$0xff]  ;;  %v800_v30 = vld [vmem:[#allocation16 + $0x68] sm:$0xff] }
 0x269   :  { %529 = vmatpush1.msra.mxu1 %v476_v38  ;;  %v802_v26 = vld [vmem:[#allocation16 + $0x78] sm:$0xff]  ;;  %v799_v32 = vld [vmem:[#allocation16 + $0x60] sm:$0xff]  ;;  %v900_v33 = vld [vmem:[#allocation18 + $0x50] sm:$0xff] }
 0x26a   :  { %2003 = vmatmul.mubr.msk.f32.vlgmr.msra.gmra.mxu1 %vm312_vm0, %v495_v39  ;;  %705 = vmatprep.subr.mxu1 %v673_v40  ;;  %v901_v31 = vld [vmem:[#allocation18 + $0x58] sm:$0xff]  ;;  %v899_v36 = vld [vmem:[#allocation18 + $0x48] sm:$0xff]  ;;  %v797_v37 = vld [vmem:[#allocation16 + $0x50] sm:$0xff] }
 0x26b   :  { %706 = vmatpush1.msra.mxu1 %v672_v41  ;;  %753 = vmatprep.mubr.f32.mxu1 %v2498_v14  ;;  %v798_v34 = vld [vmem:[#allocation16 + $0x58] sm:$0xff]  ;;  %v898_v38 = vld [vmem:[#allocation18 + $0x40] sm:$0xff]  ;;  %v796_v39 = vld [vmem:[#allocation16 + $0x48] sm:$0xff] }
 0x26c   :  { %707 = vmatprep.subr.mxu1 %v671_v42  ;;  %833 = vmatprep.subr.mxu0 %v802_v26  ;;  %v897_v40 = vld [vmem:[#allocation18 + $0x38] sm:$0xff]  ;;  %v795_v41 = vld [vmem:[#allocation16 + $0x40] sm:$0xff]  ;;  %v896_v42 = vld [vmem:[#allocation18 + $0x30] sm:$0xff] }
 0x26d   :  { %708 = vmatpush1.msra.mxu1 %v670_v43  ;;  %834 = vmatpush1.msra.mxu0 %v801_v28  ;;  %v794_v43 = vld [vmem:[#allocation16 + $0x38] sm:$0xff]  ;;  %v787_v57 = vld [vmem:[#allocation16] sm:$0xff] }
 0x26e   :  { %709 = vmatprep.subr.mxu1 %v669_v44  ;;  %835 = vmatprep.subr.mxu0 %v800_v30  ;;  %v895_v44 = vld [vmem:[#allocation18 + $0x28] sm:$0xff]  ;;  %v1078_v28 = vld [vmem:[#allocation19 + $0x1d8] sm:$0xff]  ;;  %v1077_v30 = vld [vmem:[#allocation19 + $0x1d0] sm:$0xff] }
 0x26f   :  { %710 = vmatpush1.msra.mxu1 %v668_v45  ;;  %836 = vmatpush1.msra.mxu0 %v799_v32  ;;  %v793_v45 = vld [vmem:[#allocation16 + $0x30] sm:$0xff]  ;;  %v1070_v32 = vld [vmem:[#allocation19 + $0x198] sm:$0xff] }
 0x270   :  { %711 = vmatprep.subr.mxu1 %v667_v46  ;;  %837 = vmatprep.subr.mxu0 %v798_v34  ;;  %v894_v46 = vld [vmem:[#allocation18 + $0x20] sm:$0xff]  ;;  %v1069_v34 = vld [vmem:[#allocation19 + $0x190] sm:$0xff] }
 0x271   :  { %712 = vmatpush1.msra.mxu1 %v666_v47  ;;  %838 = vmatpush1.msra.mxu0 %v797_v37  ;;  %v792_v47 = vld [vmem:[#allocation16 + $0x28] sm:$0xff]  ;;  %v1059_v37 = vld [vmem:[#allocation19 + $0x140] sm:$0xff] }
 0x272   :  { %713 = vmatprep.subr.mxu1 %v665_v48  ;;  %839 = vmatprep.subr.mxu0 %v796_v39  ;;  %v893_v48 = vld [vmem:[#allocation18 + $0x18] sm:$0xff]  ;;  %v1052_v39 = vld [vmem:[#allocation19 + $0x108] sm:$0xff] }
 0x273   :  { %714 = vmatpush1.msra.mxu1 %v664_v49  ;;  %840 = vmatpush1.msra.mxu0 %v795_v41  ;;  %v791_v49 = vld [vmem:[#allocation16 + $0x20] sm:$0xff] }
 0x274   :  { %715 = vmatprep.subr.mxu1 %v663_v50  ;;  %841 = vmatprep.subr.mxu0 %v794_v43  ;;  %v892_v50 = vld [vmem:[#allocation18 + $0x10] sm:$0xff]  ;;  %v1051_v41 = vld [vmem:[#allocation19 + $0x100] sm:$0xff]  ;;  %v1044_v43 = vld [vmem:[#allocation19 + $0xc8] sm:$0xff] }
 0x275   :  { %716 = vmatpush1.msra.mxu1 %v662_v51  ;;  %842 = vmatpush1.msra.mxu0 %v793_v45  ;;  %v790_v51 = vld [vmem:[#allocation16 + $0x18] sm:$0xff]  ;;  %v1043_v45 = vld [vmem:[#allocation19 + $0xc0] sm:$0xff] }
 0x276   :  { %717 = vmatprep.subr.mxu1 %v661_v52  ;;  %v891_v52 = vld [vmem:[#allocation18 + $0x8] sm:$0xff]  ;;  %843 = vmatprep.subr.mxu0 %v792_v47  ;;  %v1045_v47 = vld [vmem:[#allocation19 + $0xd0] sm:$0xff] }
 0x277   :  { %718 = vmatpush1.msra.mxu1 %v660_v53  ;;  %v789_v53 = vld [vmem:[#allocation16 + $0x10] sm:$0xff]  ;;  %844 = vmatpush1.msra.mxu0 %v791_v49  ;;  %v1038_v49 = vld [vmem:[#allocation19 + $0x98] sm:$0xff] }
 0x278   :  { %719 = vmatprep.subr.mxu1 %v659_v54  ;;  %v890_v54 = vld [vmem:[#allocation18] sm:$0xff]  ;;  %845 = vmatprep.subr.mxu0 %v790_v51  ;;  %v1037_v51 = vld [vmem:[#allocation19 + $0x90] sm:$0xff] }
 0x279   :  { %720 = vmatpush1.msra.mxu1 %v658_v55  ;;  %v788_v55 = vld [vmem:[#allocation16 + $0x8] sm:$0xff]  ;;  %846 = vmatpush1.msra.mxu0 %v789_v53  ;;  %v1030_v53 = vld [vmem:[#allocation19 + $0x58] sm:$0xff] }
 0x27a   :  { %2005 = vmatmul.mubr.msk.f32.vlgmr.msra.gmra.mxu1 %vm312_vm0, %v2810_v56  ;;  %937 = vmatprep.subr.mxu1 %v905_v24 }
 0x27b   :  { %985 = vmatprep.mubr.f32.mxu1 %v2498_v14  ;;  %938 = vmatpush1.msra.mxu1 %v904_v25 }
 0x27c   :  { %939 = vmatprep.subr.mxu1 %v903_v27  ;;  %847 = vmatprep.subr.mxu0 %v788_v55  ;;  %v1076_v27 = vld [vmem:[#allocation19 + $0x1c8] sm:$0xff]  ;;  %v1029_v55 = vld [vmem:[#allocation19 + $0x50] sm:$0xff] }
 0x27d   :  { %940 = vmatpush1.msra.mxu1 %v902_v29  ;;  %848 = vmatpush1.msra.mxu0 %v787_v57  ;;  %v1075_v29 = vld [vmem:[#allocation19 + $0x1c0] sm:$0xff]  ;;  %v1022_v57 = vld [vmem:[#allocation19 + $0x18] sm:$0xff] }
 0x27e   :  { %941 = vmatprep.subr.mxu1 %v901_v31  ;;  %1143 = vmatprep.subr.mxu0 %v1076_v27  ;;  %v1068_v31 = vld [vmem:[#allocation19 + $0x188] sm:$0xff] }
 0x27f   :  { %942 = vmatpush1.msra.mxu1 %v900_v33  ;;  %v1067_v33 = vld [vmem:[#allocation19 + $0x180] sm:$0xff]  ;;  %v1040_v27 = vld [vmem:[#allocation19 + $0xa8] sm:$0xff] }
 0x280   :  { %943 = vmatprep.subr.mxu1 %v899_v36  ;;  %v1062_v36 = vld [vmem:[#allocation19 + $0x158] sm:$0xff] }
 0x281   :  { %944 = vmatpush1.msra.mxu1 %v898_v38  ;;  %v1061_v38 = vld [vmem:[#allocation19 + $0x150] sm:$0xff] }
 0x282   :  { %945 = vmatprep.subr.mxu1 %v897_v40  ;;  %v1054_v40 = vld [vmem:[#allocation19 + $0x118] sm:$0xff] }
 0x283   :  { %946 = vmatpush1.msra.mxu1 %v896_v42  ;;  %v1053_v42 = vld [vmem:[#allocation19 + $0x110] sm:$0xff] }
 0x284   :  { %947 = vmatprep.subr.mxu1 %v895_v44  ;;  %v1046_v44 = vld [vmem:[#allocation19 + $0xd8] sm:$0xff] }
 0x285   :  { %948 = vmatpush1.msra.mxu1 %v894_v46 }
 0x286   :  { %949 = vmatprep.subr.mxu1 %v893_v48  ;;  %v1036_v48 = vld [vmem:[#allocation19 + $0x88] sm:$0xff] }
 0x287   :  { %950 = vmatpush1.msra.mxu1 %v892_v50  ;;  %v1035_v50 = vld [vmem:[#allocation19 + $0x80] sm:$0xff] }
 0x288   :  { %951 = vmatprep.subr.mxu1 %v891_v52  ;;  %v1028_v52 = vld [vmem:[#allocation19 + $0x48] sm:$0xff] }
 0x289   :  { %952 = vmatpush1.msra.mxu1 %v890_v54  ;;  %v1027_v54 = vld [vmem:[#allocation19 + $0x40] sm:$0xff] }
 0x28a   :  { %1214 = vmatprep.subr.mxu1 %v1078_v28  ;;  %v1042_v28 = vld [vmem:[#allocation19 + $0xb8] sm:$0xff] }
 0x323   :  { %v638_v61 = vpop.f32.mrf.mxu0 }
 0x325   :  { %v640_v11 = vpop.f32.mrf.mxu0 }
 0x32a   :  { %v564_v60 = vpop.f32.mrf.mxu1 }
 0x32b   :  { %v639_v0 = vadd.f32 %v638_v61, %v564_v60 }
 0x32c   :  { %v566_v3 = vpop.f32.mrf.mxu1 }
 0x32d   :  { %v655_v6 = vadd.f32 %v648_v1, %v639_v0  ;;  %v641_v17 = vadd.f32 %v640_v11, %v566_v3  ;;  %v906_v3 = vld [vmem:[%s2938_s15] sm:$0x3] }
 0x32f   :  { %v656_v21 = vadd.f32 %v652_v18, %v641_v17  ;;  %v915_v18 = vrot.slane %v906_v3, %v2829_v5 }
 0x33a   :  { %v755_v4 = vpop.f32.mrf.mxu1 }
 0x33b   :  { %v756_v7 = vadd.f32 %v755_v4, %v679_v2  ;;  %v803_v4 = vld [vmem:[%s2937_s14] sm:$0x3] }
 0x33c   :  { %v757_v16 = vpop.f32.mrf.mxu1 }
 0x33d   :  { %v760_v8 = vadd.f32 %v756_v7, %v655_v6  ;;  %v758_v19 = vadd.f32 %v757_v16, %v683_v15  ;;  %v911_v6 = vrot.slane %v906_v3, %v2818_v59  ;;  %v808_v7 = vrot.slane %v803_v4, %v2818_v59 }
 0x33f   :  { %v761_v9 = vsub.f32 0.0, %v760_v8 }
 0x341   :  { %v762_v10 = vmul.f32 1.442695, %v761_v9 }
 0x343   :  { %2220 = vpow2.f32 %v762_v10 }
 0x350   :  { %v2221_v12 = vpop.eup %2220 }
 0x351   :  { %v764_v13 = vadd.f32 1.0, %v2221_v12 }
 0x353   :  { %2222 = vrcp.f32 %v764_v13 }
 0x360   :  { %v2833_v20 = vpop.eup %2222 }
 0x361   :  { %v767_v22 = vmul.f32 %v2833_v20, %v758_v19  ;;  %v770_v61 = vsub.f32 1.0, %v2833_v20 }
 0x363   :  { %v768_v23 = vadd.f32 %v767_v22, %v656_v21 }
 0x365   :  { %2224 = vtanh.f32 %v768_v23 }
 0x372   :  { %v2225_v35 = vpop.eup %2224 }
 0x373   :  { %772 = vrot.lane.b32.xlu0 %v2225_v35, %s2966_s10  ;;  %v1060_v35 = vld [vmem:[#allocation19 + $0x148] sm:$0xff] }
 0x377   :  { %776 = vrot.lane.b32.xlu0 %v2810_v56, %s2966_s10  ;;  %v889_v56 = vld [vmem:[#allocation13 + $0x2] sm:$0x3] }
 0x378   :  { %2007 = vmatmul.mubr.msk.f32.vlgmr.msra.gmra.mxu1 %vm312_vm0, %v889_v56 }
 0x379   :  { %1262 = vmatprep.mubr.f32.mxu1 %v2498_v14  ;;  %1215 = vmatpush1.msra.mxu1 %v1077_v30  ;;  %v1041_v30 = vld [vmem:[#allocation19 + $0xb0] sm:$0xff] }
 0x37a   :  { %1216 = vmatprep.subr.mxu1 %v1070_v32  ;;  %v1034_v32 = vld [vmem:[#allocation19 + $0x78] sm:$0xff] }
 0x37b   :  { %1008 = vrot.lane.b32.xlu0 %v889_v56, %s2966_s10  ;;  %1217 = vmatpush1.msra.mxu1 %v1069_v34  ;;  %v1020_v56 = vld [vmem:[#allocation19 + $0x8] sm:$0xff]  ;;  %v1033_v34 = vld [vmem:[#allocation19 + $0x70] sm:$0xff] }
 0x37c   :  { %1218 = vmatprep.subr.mxu1 %v1062_v36  ;;  %v1026_v36 = vld [vmem:[#allocation19 + $0x38] sm:$0xff] }
 0x37d   :  { %1219 = vmatpush1.msra.mxu1 %v1061_v38  ;;  %v1025_v38 = vld [vmem:[#allocation19 + $0x30] sm:$0xff] }
 0x37e   :  { %1220 = vmatprep.subr.mxu1 %v1054_v40  ;;  %v1530_v40 = vld [vmem:[#allocation21 + $0x1f8] sm:$0xff] }
 0x37f   :  { %1221 = vmatpush1.msra.mxu1 %v1053_v42  ;;  %v1514_v42 = vld [vmem:[#allocation21 + $0x178] sm:$0xff] }
 0x380   :  { %1222 = vmatprep.subr.mxu1 %v1046_v44  ;;  %v1529_v44 = vld [vmem:[#allocation21 + $0x1f0] sm:$0xff] }
 0x381   :  { %1223 = vmatpush1.msra.mxu1 %v1045_v47  ;;  %v1496_v47 = vld [vmem:[#allocation21 + $0xe8] sm:$0xff] }
 0x382   :  { %1224 = vmatprep.subr.mxu1 %v1038_v49  ;;  %v1512_v49 = vld [vmem:[#allocation21 + $0x168] sm:$0xff] }
 0x383   :  { %1225 = vmatpush1.msra.mxu1 %v1037_v51  ;;  %v1527_v51 = vld [vmem:[#allocation21 + $0x1e0] sm:$0xff] }
 0x384   :  { %1226 = vmatprep.subr.mxu1 %v1030_v53  ;;  %v1511_v53 = vld [vmem:[#allocation21 + $0x160] sm:$0xff] }
 0x385   :  { %1227 = vmatpush1.msra.mxu1 %v1029_v55  ;;  %v1526_v55 = vld [vmem:[#allocation21 + $0x1d8] sm:$0xff] }
 0x386   :  { %1228 = vmatprep.subr.mxu1 %v1022_v57  ;;  %v1510_v57 = vld [vmem:[#allocation21 + $0x158] sm:$0xff] }
 0x3e5   :  { %v773_v60 = vpop.permute.xlu0 %772 }
 0x3e6   :  { %v775_v63 = vmul.f32 %v773_v60, %v770_v61  ;;  %v1019_v60 = vld [vmem:[#allocation19] sm:$0xff]  ;;  %v1021_v61 = vld [vmem:[#allocation19 + $0x10] sm:$0xff] }
 0x3e7   :  { %1229 = vmatpush1.msra.mxu1 %v1021_v61  ;;  %v1525_v61 = vld [vmem:[#allocation21 + $0x1d0] sm:$0xff] }
 0x3e9   :  { %v777_v62 = vpop.permute.xlu0 %776 }
 0x3ea   :  { %v779_v0 = vmul.f32 %v2833_v20, %v777_v62  ;;  %v812_v20 = vrot.slane %v803_v4, %v2829_v5  ;;  %v1080_v62 = vld [vmem:[#allocation19 + $0x1e8] sm:$0xff] }
 0x3ec   :  { %v780_v1 = vadd.f32 %v779_v0, %v775_v63  ;;  %v1082_v63 = vld [vmem:[#allocation19 + $0x1f8] sm:$0xff] }
 0x3ed   :  { %1356 = vmatprep.subr.mxu1 %v1082_v63  ;;  %v1009_v0 = vpop.permute.xlu0 %1008  ;;  %v1509_v63 = vld [vmem:[#allocation21 + $0x150] sm:$0xff] }
 0x3ee   :  { %782 = vrot.lane.b32.xlu1 %v780_v1, %s2966_s10 }
 0x438   :  { %v987_v8 = vpop.f32.mrf.mxu1 }
 0x439   :  { %v988_v9 = vadd.f32 %v987_v8, %v911_v6  ;;  %v1081_v8 = vld [vmem:[#allocation19 + $0x1f0] sm:$0xff] }
 0x43a   :  { %v989_v19 = vpop.f32.mrf.mxu1 }
 0x43b   :  { %v990_v22 = vadd.f32 %v989_v19, %v915_v18  ;;  %v1065_v18 = vld [vmem:[#allocation19 + $0x170] sm:$0xff]  ;;  %v1056_v19 = vld [vmem:[#allocation19 + $0x128] sm:$0xff] }
 0x460   :  { %v783_v2 = vpop.permute.xlu1 %782 }
 0x461   :  { %786 = vst.msk [vmem:[#allocation23] sm:$0x3] %vm785_vm3, %v783_v2  ;;  %2006 = vmatmul.mubr.msk.f32.vlgmr.msra.gmra.mxu0 %vm312_vm0, %v783_v2 }
 0x462   :  { %1191 = vmatprep.mubr.f32.mxu0 %v2498_v14  ;;  %1144 = vmatpush1.msra.mxu0 %v1075_v29  ;;  %v1039_v29 = vld [vmem:[#allocation19 + $0xa0] sm:$0xff] }
 0x463   :  { %1145 = vmatprep.subr.mxu0 %v1068_v31  ;;  %v1032_v31 = vld [vmem:[#allocation19 + $0x68] sm:$0xff] }
 0x464   :  { %1146 = vmatpush1.msra.mxu0 %v1067_v33  ;;  %v1031_v33 = vld [vmem:[#allocation19 + $0x60] sm:$0xff] }
 0x465   :  { %1147 = vmatprep.subr.mxu0 %v1060_v35  ;;  %v1024_v35 = vld [vmem:[#allocation19 + $0x28] sm:$0xff] }
 0x466   :  { %1148 = vmatpush1.msra.mxu0 %v1059_v37  ;;  %v1023_v37 = vld [vmem:[#allocation19 + $0x20] sm:$0xff] }
 0x467   :  { %1149 = vmatprep.subr.mxu0 %v1052_v39  ;;  %v1498_v39 = vld [vmem:[#allocation21 + $0xf8] sm:$0xff] }
 0x468   :  { %1150 = vmatpush1.msra.mxu0 %v1051_v41  ;;  %v1482_v41 = vld [vmem:[#allocation21 + $0x78] sm:$0xff] }
 0x469   :  { %1151 = vmatprep.subr.mxu0 %v1044_v43  ;;  %v1497_v43 = vld [vmem:[#allocation21 + $0xf0] sm:$0xff] }
 0x46a   :  { %1152 = vmatpush1.msra.mxu0 %v1043_v45  ;;  %v1481_v45 = vld [vmem:[#allocation21 + $0x70] sm:$0xff] }
 0x46b   :  { %1153 = vmatprep.subr.mxu0 %v1036_v48  ;;  %v1528_v48 = vld [vmem:[#allocation21 + $0x1e8] sm:$0xff] }
 0x46c   :  { %1154 = vmatpush1.msra.mxu0 %v1035_v50  ;;  %v1495_v50 = vld [vmem:[#allocation21 + $0xe0] sm:$0xff] }
 0x46d   :  { %1155 = vmatprep.subr.mxu0 %v1028_v52  ;;  %v1479_v52 = vld [vmem:[#allocation21 + $0x60] sm:$0xff] }
 0x46e   :  { %1156 = vmatpush1.msra.mxu0 %v1027_v54  ;;  %v1494_v54 = vld [vmem:[#allocation21 + $0xd8] sm:$0xff] }
 0x46f   :  { %1157 = vmatprep.subr.mxu0 %v1020_v56  ;;  %v1478_v56 = vld [vmem:[#allocation21 + $0x58] sm:$0xff] }
 0x470   :  { %1158 = vmatpush1.msra.mxu0 %v1019_v60  ;;  %v1493_v60 = vld [vmem:[#allocation21 + $0xd0] sm:$0xff] }
 0x471   :  { %1285 = vmatprep.subr.mxu0 %v1080_v62  ;;  %v1477_v62 = vld [vmem:[#allocation21 + $0x50] sm:$0xff] }
 0x521   :  { %v883_v10 = vpop.f32.mrf.mxu0 }
 0x522   :  { %v884_v12 = vadd.f32 %v883_v10, %v808_v7  ;;  %v1079_v7 = vld [vmem:[#allocation19 + $0x1e0] sm:$0xff]  ;;  %v1072_v10 = vld [vmem:[#allocation19 + $0x1a8] sm:$0xff] }
 0x523   :  { %v885_v21 = vpop.f32.mrf.mxu0 }
 0x524   :  { %v992_v13 = vadd.f32 %v988_v9, %v884_v12  ;;  %v886_v25 = vadd.f32 %v885_v21, %v812_v20  ;;  %v1074_v12 = vld [vmem:[#allocation19 + $0x1b8] sm:$0xff]  ;;  %v1055_v21 = vld [vmem:[#allocation19 + $0x120] sm:$0xff] }
 0x525   :  { %v1058_v20 = vld [vmem:[#allocation19 + $0x138] sm:$0xff] }
 0x526   :  { %v993_v11 = vsub.f32 0.0, %v992_v13  ;;  %v1071_v13 = vld [vmem:[#allocation19 + $0x1a0] sm:$0xff] }
 0x528   :  { %v994_v15 = vmul.f32 1.442695, %v993_v11  ;;  %v1073_v11 = vld [vmem:[#allocation19 + $0x1b0] sm:$0xff] }
 0x52a   :  { %2226 = vpow2.f32 %v994_v15  ;;  %v1064_v15 = vld [vmem:[#allocation19 + $0x168] sm:$0xff] }
 0x537   :  { %v2227_v16 = vpop.eup %2226 }
 0x538   :  { %v996_v17 = vadd.f32 1.0, %v2227_v16  ;;  %v1066_v16 = vld [vmem:[#allocation19 + $0x178] sm:$0xff] }
 0x53a   :  { %2228 = vrcp.f32 %v996_v17  ;;  %v1063_v17 = vld [vmem:[#allocation19 + $0x160] sm:$0xff] }
 0x547   :  { %v2858_v23 = vpop.eup %2228 }
 0x548   :  { %v999_v24 = vmul.f32 %v2858_v23, %v990_v22  ;;  %v1002_v1 = vsub.f32 1.0, %v2858_v23  ;;  %v1011_v3 = vmul.f32 %v2858_v23, %v1009_v0  ;;  %v1057_v22 = vld [vmem:[#allocation19 + $0x130] sm:$0xff]  ;;  %v1048_v23 = vld [vmem:[#allocation19 + $0xe8] sm:$0xff] }
 0x549   :  { %v1492_v0 = vld [vmem:[#allocation21 + $0xc8] sm:$0xff] }
 0x54a   :  { %v1000_v26 = vadd.f32 %v999_v24, %v886_v25  ;;  %v1050_v24 = vld [vmem:[#allocation19 + $0xf8] sm:$0xff]  ;;  %v1047_v25 = vld [vmem:[#allocation19 + $0xe0] sm:$0xff] }
 0x54c   :  { %2230 = vtanh.f32 %v1000_v26  ;;  %v1049_v26 = vld [vmem:[#allocation19 + $0xf0] sm:$0xff] }
 0x559   :  { %v2231_v46 = vpop.eup %2230 }
 0x55a   :  { %1004 = vrot.lane.b32.xlu1 %v2231_v46, %s2966_s10  ;;  %v1513_v46 = vld [vmem:[#allocation21 + $0x170] sm:$0xff] }
 0x5cc   :  { %v1005_v2 = vpop.permute.xlu1 %1004 }
 0x5cd   :  { %v1007_v4 = vmul.f32 %v1005_v2, %v1002_v1  ;;  %v1524_v1 = vld [vmem:[#allocation21 + $0x1c8] sm:$0xff] }
 0x5ce   :  { %v1476_v2 = vld [vmem:[#allocation21 + $0x48] sm:$0xff] }
 0x5cf   :  { %v1012_v6 = vadd.f32 %v1011_v3, %v1007_v4  ;;  %v1508_v3 = vld [vmem:[#allocation21 + $0x148] sm:$0xff]  ;;  %v1491_v4 = vld [vmem:[#allocation21 + $0xc0] sm:$0xff] }
 0x5d1   :  { %1014 = vrot.lane.b32.xlu1 %v1012_v6, %s2966_s10  ;;  %v1523_v6 = vld [vmem:[#allocation21 + $0x1c0] sm:$0xff] }
 0x643   :  { %v2865_v9 = vpop.permute.xlu1 %1014 }
 0x644   :  { %1018 = vst.msk [vmem:[#allocation23 + $0x2] sm:$0x3] %vm785_vm3, %v2865_v9  ;;  %2008 = vmatmul.mubr.msk.f32.vlgmr.msra.gmra.mxu0 %vm312_vm0, %v2865_v9  ;;  %2009 = vmatmul.mubr.msk.f32.vlgmr.msra.gmra.mxu1 %vm312_vm0, %v2865_v9 }
 0x645   :  { %1286 = vmatpush1.msra.mxu0 %v1079_v7  ;;  %1357 = vmatpush1.msra.mxu1 %v1081_v8  ;;  %v1475_v7 = vld [vmem:[#allocation21 + $0x40] sm:$0xff] }
 0x646   :  { %1287 = vmatprep.subr.mxu0 %v1072_v10  ;;  %1358 = vmatprep.subr.mxu1 %v1074_v12  ;;  %v1507_v8 = vld [vmem:[#allocation21 + $0x140] sm:$0xff]  ;;  %v1522_v10 = vld [vmem:[#allocation21 + $0x1b8] sm:$0xff] }
 0x647   :  { %1288 = vmatpush1.msra.mxu0 %v1071_v13  ;;  %1359 = vmatpush1.msra.mxu1 %v1073_v11  ;;  %v1474_v12 = vld [vmem:[#allocation21 + $0x38] sm:$0xff]  ;;  %v1489_v11 = vld [vmem:[#allocation21 + $0xb0] sm:$0xff] }
 0x648   :  { %1289 = vmatprep.subr.mxu0 %v1064_v15  ;;  %1360 = vmatprep.subr.mxu1 %v1066_v16  ;;  %v1506_v13 = vld [vmem:[#allocation21 + $0x138] sm:$0xff]  ;;  %v1521_v15 = vld [vmem:[#allocation21 + $0x1b0] sm:$0xff] }
 0x649   :  { %1290 = vmatpush1.msra.mxu0 %v1063_v17  ;;  %1361 = vmatpush1.msra.mxu1 %v1065_v18  ;;  %v1473_v16 = vld [vmem:[#allocation21 + $0x30] sm:$0xff]  ;;  %v1488_v18 = vld [vmem:[#allocation21 + $0xa8] sm:$0xff] }
 0x64a   :  { %1291 = vmatprep.subr.mxu0 %v1056_v19  ;;  %1362 = vmatprep.subr.mxu1 %v1058_v20  ;;  %v1505_v17 = vld [vmem:[#allocation21 + $0x130] sm:$0xff]  ;;  %v1520_v19 = vld [vmem:[#allocation21 + $0x1a8] sm:$0xff] }
 0x64b   :  { %1292 = vmatpush1.msra.mxu0 %v1055_v21  ;;  %1363 = vmatpush1.msra.mxu1 %v1057_v22  ;;  %v1472_v20 = vld [vmem:[#allocation21 + $0x28] sm:$0xff]  ;;  %v1487_v22 = vld [vmem:[#allocation21 + $0xa0] sm:$0xff] }
 0x64c   :  { %1293 = vmatprep.subr.mxu0 %v1048_v23  ;;  %1364 = vmatprep.subr.mxu1 %v1050_v24  ;;  %v1504_v21 = vld [vmem:[#allocation21 + $0x128] sm:$0xff]  ;;  %v1519_v23 = vld [vmem:[#allocation21 + $0x1a0] sm:$0xff] }
 0x64d   :  { %1294 = vmatpush1.msra.mxu0 %v1047_v25  ;;  %1365 = vmatpush1.msra.mxu1 %v1049_v26  ;;  %v1471_v24 = vld [vmem:[#allocation21 + $0x20] sm:$0xff]  ;;  %v1486_v26 = vld [vmem:[#allocation21 + $0x98] sm:$0xff] }
 0x64e   :  { %1295 = vmatprep.subr.mxu0 %v1040_v27  ;;  %1366 = vmatprep.subr.mxu1 %v1042_v28  ;;  %v1503_v25 = vld [vmem:[#allocation21 + $0x120] sm:$0xff]  ;;  %v1518_v27 = vld [vmem:[#allocation21 + $0x198] sm:$0xff] }
 0x64f   :  { %1296 = vmatpush1.msra.mxu0 %v1039_v29  ;;  %1367 = vmatpush1.msra.mxu1 %v1041_v30  ;;  %v1470_v28 = vld [vmem:[#allocation21 + $0x18] sm:$0xff]  ;;  %v1485_v30 = vld [vmem:[#allocation21 + $0x90] sm:$0xff] }
 0x650   :  { %1297 = vmatprep.subr.mxu0 %v1032_v31  ;;  %1368 = vmatprep.subr.mxu1 %v1034_v32  ;;  %v1502_v29 = vld [vmem:[#allocation21 + $0x118] sm:$0xff]  ;;  %v1517_v31 = vld [vmem:[#allocation21 + $0x190] sm:$0xff] }
 0x651   :  { %1298 = vmatpush1.msra.mxu0 %v1031_v33  ;;  %1369 = vmatpush1.msra.mxu1 %v1033_v34  ;;  %v1469_v32 = vld [vmem:[#allocation21 + $0x10] sm:$0xff]  ;;  %v1484_v34 = vld [vmem:[#allocation21 + $0x88] sm:$0xff] }
 0x652   :  { %1299 = vmatprep.subr.mxu0 %v1024_v35  ;;  %1370 = vmatprep.subr.mxu1 %v1026_v36  ;;  %v1501_v33 = vld [vmem:[#allocation21 + $0x110] sm:$0xff]  ;;  %v1516_v35 = vld [vmem:[#allocation21 + $0x188] sm:$0xff] }
 0x653   :  { %1300 = vmatpush1.msra.mxu0 %v1023_v37  ;;  %1333 = vmatprep.mubr.f32.mxu0 %v2498_v14  ;;  %v1468_v36 = vld [vmem:[#allocation21 + $0x8] sm:$0xff] }
 0x654   :  { %1371 = vmatpush1.msra.mxu1 %v1025_v38  ;;  %1404 = vmatprep.mubr.f32.mxu1 %v2498_v14  ;;  %v1480_v14 = vld [vmem:[#allocation21 + $0x68] sm:$0xff]  ;;  %v1483_v38 = vld [vmem:[#allocation21 + $0x80] sm:$0xff] }
 0x655   :  { %2010 = vmatmul.mubr.msk.f32.vlgmr.msra.gmra.mxu0 %vm312_vm0, %v2865_v9  ;;  %2011 = vmatmul.mubr.msk.f32.vlgmr.msra.gmra.mxu1 %vm312_vm0, %v2865_v9  ;;  %v1490_v9 = vld [vmem:[#allocation21 + $0xb8] sm:$0xff]  ;;  %v1500_v37 = vld [vmem:[#allocation21 + $0x108] sm:$0xff] }
 0x656   :  { %2027 = vmatprep.subr.mxu0 %v1498_v39  ;;  %2062 = vmatprep.subr.mxu1 %v1530_v40  ;;  %v1515_v39 = vld [vmem:[#allocation21 + $0x180] sm:$0xff] }
 0x657   :  { %2028 = vmatpush3.msra.mxu0 %v1482_v41  ;;  %2063 = vmatpush3.msra.mxu1 %v1514_v42  ;;  %v1467_v40 = vld [vmem:[#allocation21] sm:$0xff]  ;;  %v1562_v42 = vld [vmem:[#allocation21 + $0x2f8] sm:$0xff] }
 0x658   :  { %2029 = vmatprep.subr.mxu0 %v1497_v43  ;;  %2064 = vmatprep.subr.mxu1 %v1529_v44  ;;  %v1499_v41 = vld [vmem:[#allocation21 + $0x100] sm:$0xff]  ;;  %v1594_v43 = vld [vmem:[#allocation21 + $0x3f8] sm:$0xff]  ;;  %v1095_v44 = vsub.s32 2, %v2815_v58 }
 0x659   :  { %2030 = vmatpush3.msra.mxu0 %v1481_v45  ;;  %2065 = vmatpush3.msra.mxu1 %v1513_v46  ;;  %v1083_v45 = vld [vmem:[%s2940_s17] sm:$0xff]  ;;  %v1099_v46 = vsub.s32 3, %v2815_v58  ;;  %s2500_s17 = smov [#allocation23]  }
 0x65a   :  { %2031 = vmatprep.subr.mxu0 %v1496_v47  ;;  %2066 = vmatprep.subr.mxu1 %v1528_v48  ;;  %v2499_v47 = vmov 1983009808   ;;  %s1942_s16 = sshll.u32 %s2500_s17, 4  ;;  %s1943_s16 = int_to_ptr.vmem [resolvable:$true] %s1942_s16 }
 0x65b   :  { %2032 = vmatpush3.msra.mxu0 %v1480_v14  ;;  %2067 = vmatpush3.msra.mxu1 %v1512_v49  ;;  %v1430_v48 = vunpack.c.l.s4 %v2499_v47  ;;  %v1088_v14 = vrot.slane %v1083_v45, %v2818_v59  ;;  %v1096_v49 = vrot.slane %v1083_v45, %v1095_v44  ;;  %v1558_v47 = vld [vmem:[#allocation21 + $0x2d8] sm:$0xff]  ;;  %s2420_s26 = scalar_lea.vmem %s1943_s16, 64  ;;  %p2425_p4 = scmp.lt.s32.totalorder %s1943_s16, %s1943_s16 }
 0x65c   :  { %2033 = vmatprep.subr.mxu0 %v1495_v50  ;;  %2068 = vmatprep.subr.mxu1 %v1527_v51  ;;  %v1092_v50 = vrot.slane %v1083_v45, %v2829_v5  ;;  %v1100_v51 = vrot.slane %v1083_v45, %v1099_v46  ;;  %v1575_v46 = vld [vmem:[#allocation21 + $0x360] sm:$0xff]  ;;  %p2421_p3 = scmp.ne.s32.totalorder %s1943_s16, %s2420_s26  ;;  %p2426_p5 = scmp.lt.s32.totalorder %s2420_s26, %s2420_s26 }
 0x65d   :  { %2034 = vmatpush3.msra.mxu0 %v1479_v52  ;;  %2069 = vmatpush3.msra.mxu1 %v1511_v53 }
 0x65e   :  { %2035 = vmatprep.subr.mxu0 %v1494_v54  ;;  %2070 = vmatprep.subr.mxu1 %v1526_v55  ;;  %v1431_v54 = vunpack.c.0.s8 %v1430_v48  ;;  %v1590_v48 = vld [vmem:[#allocation21 + $0x3d8] sm:$0xff]  ;;  %p2427_p6 = por %p2426_p5, %p2425_p4 }
 0x65f   :  { %2036 = vmatpush3.msra.mxu0 %v1478_v56  ;;  %2071 = vmatpush3.msra.mxu1 %v1510_v57 }
 0x660   :  { %2037 = vmatprep.subr.mxu0 %v1493_v60  ;;  %2072 = vmatprep.subr.mxu1 %v1525_v61  ;;  %p2428_p7 = pnand %p2427_p6, %p2421_p3 }
 0x661   :  { %2038 = vmatpush3.msra.mxu0 %v1477_v62  ;;  %2073 = vmatpush3.msra.mxu1 %v1509_v63  ;;  %v2887_v63 = vsub.s32 %v1431_v54, %v2815_v58 }
 0x662   :  { %2039 = vmatprep.subr.mxu0 %v1492_v0  ;;  %2074 = vmatprep.subr.mxu1 %v1524_v1 }
 0x663   :  { %2040 = vmatpush3.msra.mxu0 %v1476_v2  ;;  %2075 = vmatpush3.msra.mxu1 %v1508_v3 }
 0x664   :  { %2041 = vmatprep.subr.mxu0 %v1491_v4  ;;  %2076 = vmatprep.subr.mxu1 %v1523_v6 }
 0x665   :  { %2042 = vmatpush3.msra.mxu0 %v1475_v7  ;;  %2077 = vmatpush3.msra.mxu1 %v1507_v8  ;;  %v1103_v7 = vsub.s32 4, %v2815_v58  ;;  %v1111_v8 = vsub.s32 6, %v2815_v58 }
 0x666   :  { %2043 = vmatprep.subr.mxu0 %v1490_v9  ;;  %2078 = vmatprep.subr.mxu1 %v1522_v10 }
 0x667   :  { %2044 = vmatpush3.msra.mxu0 %v1474_v12  ;;  %2079 = vmatpush3.msra.mxu1 %v1506_v13  ;;  %v1107_v12 = vsub.s32 5, %v2815_v58  ;;  %v1115_v13 = vsub.s32 7, %v2815_v58 }
 0x668   :  { %2045 = vmatprep.subr.mxu0 %v1489_v11  ;;  %2080 = vmatprep.subr.mxu1 %v1521_v15 }
 0x669   :  { %2046 = vmatpush3.msra.mxu0 %v1473_v16  ;;  %2081 = vmatpush3.msra.mxu1 %v1505_v17  ;;  %v1104_v16 = vrot.slane %v1083_v45, %v1103_v7  ;;  %v1112_v17 = vrot.slane %v1083_v45, %v1111_v8 }
 0x66a   :  { %2047 = vmatprep.subr.mxu0 %v1488_v18  ;;  %2082 = vmatprep.subr.mxu1 %v1520_v19 }
 0x66b   :  { %2048 = vmatpush3.msra.mxu0 %v1472_v20  ;;  %2083 = vmatpush3.msra.mxu1 %v1504_v21  ;;  %v1108_v20 = vrot.slane %v1083_v45, %v1107_v12  ;;  %v1116_v21 = vrot.slane %v1083_v45, %v1115_v13  ;;  %v1543_v45 = vld [vmem:[#allocation21 + $0x260] sm:$0xff]  ;;  %v1586_v12 = vld [vmem:[#allocation21 + $0x3b8] sm:$0xff] }
 0x66c   :  { %2049 = vmatprep.subr.mxu0 %v1487_v22  ;;  %2084 = vmatprep.subr.mxu1 %v1519_v23  ;;  %v1546_v22 = vld [vmem:[#allocation21 + $0x278] sm:$0xff] }
 0x66d   :  { %2050 = vmatpush3.msra.mxu0 %v1471_v24  ;;  %2085 = vmatpush3.msra.mxu1 %v1503_v25  ;;  %v1578_v23 = vld [vmem:[#allocation21 + $0x378] sm:$0xff] }
 0x66e   :  { %2051 = vmatprep.subr.mxu0 %v1486_v26  ;;  %2086 = vmatprep.subr.mxu1 %v1518_v27  ;;  %v1561_v26 = vld [vmem:[#allocation21 + $0x2f0] sm:$0xff]  ;;  %v1538_v13 = vld [vmem:[#allocation21 + $0x238] sm:$0xff] }
 0x66f   :  { %2052 = vmatpush3.msra.mxu0 %v1470_v28  ;;  %2087 = vmatpush3.msra.mxu1 %v1502_v29  ;;  %v1593_v27 = vld [vmem:[#allocation21 + $0x3f0] sm:$0xff] }
 0x670   :  { %2053 = vmatprep.subr.mxu0 %v1485_v30  ;;  %2088 = vmatprep.subr.mxu1 %v1517_v31  ;;  %v1545_v29 = vld [vmem:[#allocation21 + $0x270] sm:$0xff] }
 0x671   :  { %2054 = vmatpush3.msra.mxu0 %v1469_v32  ;;  %2089 = vmatpush3.msra.mxu1 %v1501_v33  ;;  %v1577_v30 = vld [vmem:[#allocation21 + $0x370] sm:$0xff]  ;;  %v1560_v33 = vld [vmem:[#allocation21 + $0x2e8] sm:$0xff] }
 0x672   :  { %2055 = vmatprep.subr.mxu0 %v1484_v34  ;;  %2090 = vmatprep.subr.mxu1 %v1516_v35  ;;  %v1592_v34 = vld [vmem:[#allocation21 + $0x3e8] sm:$0xff] }
 0x673   :  { %2056 = vmatpush3.msra.mxu0 %v1468_v36  ;;  %2091 = vmatpush3.msra.mxu1 %v1500_v37  ;;  %v1544_v37 = vld [vmem:[#allocation21 + $0x268] sm:$0xff] }
 0x674   :  { %2057 = vmatprep.subr.mxu0 %v1483_v38  ;;  %2092 = vmatprep.subr.mxu1 %v1515_v39  ;;  %v1576_v38 = vld [vmem:[#allocation21 + $0x368] sm:$0xff]  ;;  %v1559_v39 = vld [vmem:[#allocation21 + $0x2e0] sm:$0xff] }
 0x675   :  { %2058 = vmatpush3.msra.mxu0 %v1467_v40  ;;  %2093 = vmatpush3.msra.mxu1 %v1499_v41  ;;  %v1591_v40 = vld [vmem:[#allocation21 + $0x3e0] sm:$0xff] }
 0x676   :  { %2097 = vmatprep.subr.mxu0 %v1562_v42  ;;  %2132 = vmatprep.subr.mxu1 %v1594_v43 }
 0x704   :  { %v1193_v52 = vpop.f32.mrf.mxu0  ;;  %v1264_v53 = vpop.f32.mrf.mxu1 }
 0x705   :  { %v1194_v55 = vadd.f32 %v1193_v52, %v1088_v14  ;;  %v1265_v56 = vadd.f32 %v1264_v53, %v1096_v49  ;;  %v1557_v52 = vld [vmem:[#allocation21 + $0x2d0] sm:$0xff] }
 0x706   :  { %v1195_v57 = vpop.f32.mrf.mxu0  ;;  %v1266_v60 = vpop.f32.mrf.mxu1  ;;  %v1589_v53 = vld [vmem:[#allocation21 + $0x3d0] sm:$0xff] }
 0x707   :  { %v1196_v61 = vadd.f32 %v1195_v57, %v1092_v50  ;;  %v1267_v62 = vadd.f32 %v1266_v60, %v1100_v51  ;;  %v1411_v0 = vmax.f32 %v1194_v55, 0.0  ;;  %v1413_v1 = vmax.f32 %v1265_v56, 0.0  ;;  %v1542_v50 = vld [vmem:[#allocation21 + $0x258] sm:$0xff]  ;;  %v1541_v56 = vld [vmem:[#allocation21 + $0x250] sm:$0xff]  ;;  %v1556_v60 = vld [vmem:[#allocation21 + $0x2c8] sm:$0xff] }
 0x708   :  { %v1574_v51 = vld [vmem:[#allocation21 + $0x358] sm:$0xff]  ;;  %v1573_v57 = vld [vmem:[#allocation21 + $0x350] sm:$0xff] }
 0x709   :  { %v1412_v2 = vmax.f32 %v1196_v61, 0.0  ;;  %v1414_v59 = vmax.f32 %v1267_v62, 0.0  ;;  %v1588_v61 = vld [vmem:[#allocation21 + $0x3c8] sm:$0xff] }
 0x70b   :  { %v1427_v3 = vcombine.low %v1411_v0, %v1412_v2  ;;  %v1428_v4 = vcombine.low %v1413_v1, %v1414_v59  ;;  %v1540_v1 = vld [vmem:[#allocation21 + $0x248] sm:$0xff]  ;;  %v1555_v59 = vld [vmem:[#allocation21 + $0x2c0] sm:$0xff] }
 0x70c   :  { %v1572_v2 = vld [vmem:[#allocation21 + $0x348] sm:$0xff] }
 0x70d   :  { %v1435_v5 = vrot.slane %v1427_v3, %v2887_v63  ;;  %v1442_v6 = vrot.slane %v1428_v4, %v2887_v63  ;;  %v1587_v3 = vld [vmem:[#allocation21 + $0x3c0] sm:$0xff] }
 0x70e   :  { %v1539_v4 = vld [vmem:[#allocation21 + $0x240] sm:$0xff] }
 0x70f   :  { %v1443_v9 = vcombine.low %v1435_v5, %v1442_v6  ;;  %v2015_v10 = vcombine.low %v1442_v6, %v1442_v6  ;;  %v1571_v6 = vld [vmem:[#allocation21 + $0x340] sm:$0xff] }
 0x711   :  { %v1611_v11 = vrot.slane %v1443_v9, %v2887_v63  ;;  %v1618_v15 = vrot.slane %v2015_v10, %v2887_v63  ;;  %v1554_v10 = vld [vmem:[#allocation21 + $0x2b8] sm:$0xff] }
 0x713   :  { %v1619_v18 = vcombine.high %v1611_v11, %v1611_v11  ;;  %v1620_v19 = vcombine.high %v1618_v15, %v1618_v15 }
 0x715   :  { %v1335_v24 = vpop.f32.mrf.mxu0  ;;  %v1406_v25 = vpop.f32.mrf.mxu1  ;;  %1710 = vmatprep.mubr.f32.mxu0 %v1619_v18  ;;  %1780 = vmatprep.mubr.f32.mxu1 %v1620_v19  ;;  %v1552_v18 = vld [vmem:[#allocation21 + $0x2a8] sm:$0xff] }
 0x716   :  { %v1336_v28 = vadd.f32 %v1335_v24, %v1104_v16  ;;  %v1407_v58 = vadd.f32 %v1406_v25, %v1112_v17  ;;  %1711 = vmatmul.mubr.f32.vlgmr.msra.gmra.mxu0 %v1611_v11  ;;  %1781 = vmatmul.mubr.f32.vlgmr.msra.gmra.mxu1 %v1618_v15  ;;  %v1570_v11 = vld [vmem:[#allocation21 + $0x338] sm:$0xff]  ;;  %v1585_v15 = vld [vmem:[#allocation21 + $0x3b0] sm:$0xff]  ;;  %v1584_v19 = vld [vmem:[#allocation21 + $0x3a8] sm:$0xff] }
 0x717   :  { %v1337_v31 = vpop.f32.mrf.mxu0  ;;  %v1408_v32 = vpop.f32.mrf.mxu1  ;;  %2098 = vmatpush3.msra.mxu0 %v1546_v22  ;;  %2133 = vmatpush3.msra.mxu1 %v1578_v23  ;;  %v1537_v16 = vld [vmem:[#allocation21 + $0x230] sm:$0xff]  ;;  %v1551_v22 = vld [vmem:[#allocation21 + $0x2a0] sm:$0xff] }
 0x718   :  { %v1338_v35 = vadd.f32 %v1337_v31, %v1108_v20  ;;  %v1409_v36 = vadd.f32 %v1408_v32, %v1116_v21  ;;  %2099 = vmatprep.subr.mxu0 %v1561_v26  ;;  %2134 = vmatprep.subr.mxu1 %v1593_v27  ;;  %v1415_v41 = vmax.f32 %v1336_v28, 0.0  ;;  %v1417_v42 = vmax.f32 %v1407_v58, 0.0  ;;  %v1569_v17 = vld [vmem:[#allocation21 + $0x330] sm:$0xff]  ;;  %v1536_v20 = vld [vmem:[#allocation21 + $0x228] sm:$0xff]  ;;  %v1583_v23 = vld [vmem:[#allocation21 + $0x3a0] sm:$0xff] }
 0x719   :  { %2100 = vmatpush3.msra.mxu0 %v1545_v29  ;;  %2135 = vmatpush3.msra.mxu1 %v1577_v30  ;;  %v1568_v21 = vld [vmem:[#allocation21 + $0x328] sm:$0xff]  ;;  %v1535_v24 = vld [vmem:[#allocation21 + $0x220] sm:$0xff]  ;;  %v1550_v26 = vld [vmem:[#allocation21 + $0x298] sm:$0xff] }
 0x71a   :  { %v1416_v43 = vmax.f32 %v1338_v35, 0.0  ;;  %v1418_v44 = vmax.f32 %v1409_v36, 0.0  ;;  %2101 = vmatprep.subr.mxu0 %v1560_v33  ;;  %2136 = vmatprep.subr.mxu1 %v1592_v34  ;;  %v1567_v25 = vld [vmem:[#allocation21 + $0x320] sm:$0xff]  ;;  %v1582_v27 = vld [vmem:[#allocation21 + $0x398] sm:$0xff]  ;;  %v1549_v29 = vld [vmem:[#allocation21 + $0x290] sm:$0xff] }
 0x71b   :  { %2102 = vmatpush3.msra.mxu0 %v1544_v37  ;;  %2137 = vmatpush3.msra.mxu1 %v1576_v38  ;;  %v1534_v28 = vld [vmem:[#allocation21 + $0x218] sm:$0xff]  ;;  %v1581_v30 = vld [vmem:[#allocation21 + $0x390] sm:$0xff]  ;;  %v1548_v33 = vld [vmem:[#allocation21 + $0x288] sm:$0xff] }
 0x71c   :  { %v1444_v14 = vcombine.low %v1415_v41, %v1416_v43  ;;  %v1445_v49 = vcombine.low %v1417_v42, %v1418_v44  ;;  %2103 = vmatprep.subr.mxu0 %v1559_v39  ;;  %2138 = vmatprep.subr.mxu1 %v1591_v40  ;;  %v1566_v58 = vld [vmem:[#allocation21 + $0x318] sm:$0xff]  ;;  %v1533_v31 = vld [vmem:[#allocation21 + $0x210] sm:$0xff]  ;;  %v1580_v34 = vld [vmem:[#allocation21 + $0x388] sm:$0xff] }
 0x71d   :  { %2104 = vmatpush3.msra.mxu0 %v1543_v45  ;;  %2139 = vmatpush3.msra.mxu1 %v1575_v46  ;;  %v1565_v32 = vld [vmem:[#allocation21 + $0x310] sm:$0xff]  ;;  %v1532_v35 = vld [vmem:[#allocation21 + $0x208] sm:$0xff]  ;;  %v1547_v37 = vld [vmem:[#allocation21 + $0x280] sm:$0xff] }
 0x71e   :  { %v1452_v54 = vrot.slane %v1444_v14, %v2887_v63  ;;  %v1459_v55 = vrot.slane %v1445_v49, %v2887_v63  ;;  %2105 = vmatprep.subr.mxu0 %v1558_v47  ;;  %2140 = vmatprep.subr.mxu1 %v1590_v48  ;;  %v1564_v36 = vld [vmem:[#allocation21 + $0x308] sm:$0xff]  ;;  %v1579_v38 = vld [vmem:[#allocation21 + $0x380] sm:$0xff] }
 0x71f   :  { %2106 = vmatpush3.msra.mxu0 %v1542_v50  ;;  %2141 = vmatpush3.msra.mxu1 %v1574_v51  ;;  %v1531_v39 = vld [vmem:[#allocation21 + $0x200] sm:$0xff] }
 0x720   :  { %v1460_v62 = vcombine.low %v1452_v54, %v1459_v55  ;;  %v2016_v0 = vcombine.low %v1459_v55, %v1459_v55  ;;  %2107 = vmatprep.subr.mxu0 %v1557_v52  ;;  %2142 = vmatprep.subr.mxu1 %v1589_v53  ;;  %v1563_v40 = vld [vmem:[#allocation21 + $0x300] sm:$0xff] }
 0x721   :  { %2108 = vmatpush3.msra.mxu0 %v1541_v56  ;;  %2143 = vmatpush3.msra.mxu1 %v1573_v57 }
 0x722   :  { %2109 = vmatprep.subr.mxu0 %v1556_v60  ;;  %2144 = vmatprep.subr.mxu1 %v1588_v61  ;;  %v2900_v5 = vrot.slane %v1460_v62, %v2887_v63  ;;  %v2903_v7 = vrot.slane %v2016_v0, %v2887_v63  ;;  %v1553_v63 = vld [vmem:[#allocation21 + $0x2b0] sm:$0xff] }
 0x723   :  { %2110 = vmatpush3.msra.mxu0 %v1540_v1  ;;  %2145 = vmatpush3.msra.mxu1 %v1572_v2 }
 0x724   :  { %2111 = vmatprep.subr.mxu0 %v1555_v59  ;;  %2146 = vmatprep.subr.mxu1 %v1587_v3  ;;  %v1636_v8 = vcombine.high %v2900_v5, %v2900_v5  ;;  %v1637_v9 = vcombine.high %v2903_v7, %v2903_v7 }
 0x725   :  { %2112 = vmatpush3.msra.mxu0 %v1539_v4  ;;  %2147 = vmatpush3.msra.mxu1 %v1571_v6 }
 0x726   :  { %1850 = vmatprep.mubr.f32.mxu0 %v1636_v8  ;;  %1920 = vmatprep.mubr.f32.mxu1 %v1637_v9 }
 0x727   :  { %2113 = vmatprep.subr.mxu0 %v1554_v10  ;;  %2148 = vmatprep.subr.mxu1 %v1586_v12 }
 0x728   :  { %2114 = vmatpush3.msra.mxu0 %v1538_v13  ;;  %2149 = vmatpush3.msra.mxu1 %v1570_v11 }
 0x729   :  { %2115 = vmatprep.subr.mxu0 %v1553_v63  ;;  %2150 = vmatprep.subr.mxu1 %v1585_v15 }
 0x72a   :  { %2116 = vmatpush3.msra.mxu0 %v1537_v16  ;;  %2151 = vmatpush3.msra.mxu1 %v1569_v17 }
 0x72b   :  { %2117 = vmatprep.subr.mxu0 %v1552_v18  ;;  %2152 = vmatprep.subr.mxu1 %v1584_v19 }
 0x72c   :  { %2118 = vmatpush3.msra.mxu0 %v1536_v20  ;;  %2153 = vmatpush3.msra.mxu1 %v1568_v21 }
 0x72d   :  { %2119 = vmatprep.subr.mxu0 %v1551_v22  ;;  %2154 = vmatprep.subr.mxu1 %v1583_v23 }
 0x72e   :  { %2120 = vmatpush3.msra.mxu0 %v1535_v24  ;;  %2155 = vmatpush3.msra.mxu1 %v1567_v25 }
 0x72f   :  { %2121 = vmatprep.subr.mxu0 %v1550_v26  ;;  %2156 = vmatprep.subr.mxu1 %v1582_v27 }
 0x730   :  { %2122 = vmatpush3.msra.mxu0 %v1534_v28  ;;  %2157 = vmatpush3.msra.mxu1 %v1566_v58 }
 0x731   :  { %2123 = vmatprep.subr.mxu0 %v1549_v29  ;;  %2158 = vmatprep.subr.mxu1 %v1581_v30 }
 0x732   :  { %2124 = vmatpush3.msra.mxu0 %v1533_v31  ;;  %2159 = vmatpush3.msra.mxu1 %v1565_v32 }
 0x733   :  { %2125 = vmatprep.subr.mxu0 %v1548_v33  ;;  %2160 = vmatprep.subr.mxu1 %v1580_v34 }
 0x734   :  { %2126 = vmatpush3.msra.mxu0 %v1532_v35  ;;  %2161 = vmatpush3.msra.mxu1 %v1564_v36 }
 0x735   :  { %2127 = vmatprep.subr.mxu0 %v1547_v37  ;;  %2162 = vmatprep.subr.mxu1 %v1579_v38 }
 0x736   :  { %2128 = vmatpush3.msra.mxu0 %v1531_v39  ;;  %2163 = vmatpush3.msra.mxu1 %v1563_v40 }
 0x737   :  { %1851 = vmatmul.mubr.f32.vlgmr.msra.gmra.mxu0 %v2900_v5  ;;  %1921 = vmatmul.mubr.f32.vlgmr.msra.gmra.mxu1 %v2903_v7 }
 0x738   :  { %2431 = shalt.err (!%p2428_p7)
}
 0x739   :  { %s2967_s25 = smov 2   ;;  %s2968_s6 = smov 32   ;;  %v2012_v45 = vld [vmem:[%s2942_s19] ss:$0 sm:$0xff] }
 0x73a   :  { %1948 = dma.vmem_to_hbm [thread:$0]  %s1943_s16, 64, %s2944_s21, [#allocation24], %s2968_s6, %s2968_s6, %s2967_s25  }
 0x73b   :  { %s2501_s3 = smov [#allocation22]  }
 0x73c   :  { %s1933_s7 = sshll.u32 %s2501_s3, 4  ;;  %s1934_s7 = int_to_ptr.vmem [resolvable:$true] %s1933_s7 }
 0x73d   :  { %s2440_s21 = scalar_lea.vmem %s1934_s7, 32  ;;  %p2445_p9 = scmp.lt.s32.totalorder %s1934_s7, %s1934_s7 }
 0x73e   :  { %p2441_p8 = scmp.ne.s32.totalorder %s1934_s7, %s2440_s21  ;;  %p2446_p10 = scmp.lt.s32.totalorder %s2440_s21, %s2440_s21 }
 0x740   :  { %p2447_p11 = por %p2446_p10, %p2445_p9 }
 0x742   :  { %p2448_p12 = pnand %p2447_p11, %p2441_p8 }
 0x7d6   :  { %v2059_v41 = vpop.f32.mrf.mxu0  ;;  %v2094_v43 = vpop.f32.mrf.mxu1 }
 0x7d8   :  { %v2060_v42 = vpop.f32.mrf.mxu0  ;;  %v2095_v46 = vpop.f32.mrf.mxu1 }
 0x7d9   :  { %v2061_v44 = vadd.f32 %v2060_v42, %v2059_v41  ;;  %v2096_v49 = vadd.f32 %v2095_v46, %v2094_v43 }
 0x7db   :  { %v1713_v47 = vadd.f32 %v2061_v44, %v2012_v45 }
 0x7dd   :  { %v1783_v52 = vadd.f32 %v2096_v49, %v1713_v47 }
 0x7f7   :  { %v2129_v48 = vpop.f32.mrf.mxu0  ;;  %v2164_v14 = vpop.f32.mrf.mxu1 }
 0x7f9   :  { %v2130_v50 = vpop.f32.mrf.mxu0  ;;  %v2165_v51 = vpop.f32.mrf.mxu1 }
 0x7fa   :  { %v2131_v53 = vadd.f32 %v2130_v50, %v2129_v48  ;;  %v2166_v55 = vadd.f32 %v2165_v51, %v2164_v14 }
 0x7fc   :  { %v1853_v54 = vadd.f32 %v2131_v53, %v1783_v52 }
 0x7fe   :  { %v1923_v56 = vadd.f32 %v2166_v55, %v1853_v54 }
 0x800   :  { %1926 = vst [vmem:[#allocation22] sm:$0x3] %v1923_v56 }
 0x801   :  { %2451 = shalt.err (!%p2448_p12)
}
 0x802   :  { %1936 = dma.vmem_to_hbm [thread:$0]  %s1934_s7, 32, %s2943_s20, [#allocation7]  }
 0x803   :  { %2476 = dma.done.wait [#allocation7], 32  }
 0x804   :  { %2477 = vsyncadd [#allocation7], 4294967264 }
 0x805   :  { %2478 = dma.done.wait [#allocation24], 64  }
 0x806   :  { %2479 = vsyncadd [#allocation24], 4294967232 }
 0x807   :  { %1955 = vsyncpa [#allocation6], 1 }
 0x808   :  { %1956 = vsyncpa [#allocation11], 1 }
 0x809   :  { %1957 = vsyncpa [#allocation14], 1 }
 0x80a   :  { %1958 = vsyncpa [#allocation17], 1 }
 0x80b   :  { %1959 = vsyncpa [#allocation20], 1 }
 0x80c   :  { %1960 = vsyncpa [#allocation7], 1 }
 0x80d   :  { %1961 = vsyncpa [#allocation24], 1 }
 0x80e   :  { %1962 = vsyncpa [#allocation8], 1 }
 0x80f   :  { %1963 = vsyncmov [#allocation3] }
 0x812   :  { %s1964_s13 = vpop.sfrf %1963 }
 0x813   :  { %p2013_p13 = scmp.ne.s32.totalorder %s1964_s13, 0 }
 0x815   :  { %1968 = shalt.err (%p2013_p13)  }
 0x816   :  { %1970 = vsyncmov [#allocation3 + $0x1] }
 0x819   :  { %s1971_s8 = vpop.sfrf %1970 }
 0x81a   :  { %p2014_p0 = scmp.ne.s32.totalorder %s1971_s8, 0 }
 0x81c   :  { %1975 = shalt.err (%p2014_p0)  }

</bundles_post_ra>
